<compile_context>
chip_gen: v7x
topology: tpu7x:2x2x1
jax: 0.10.0
libtpu: 0.0.40
codegen_flags: <defaults>
</compile_context>

<pallas_src>
import functools
import math
from types import SimpleNamespace

import jax
import jax.numpy as jnp
from jax import lax
from jax.experimental import pallas as pl
from jax.experimental.pallas import tpu as pltpu


# ---------------------------------------------------------------------------
# Fused Generator kernel: one grid step == `bb` lane-packed batch elements.
# ---------------------------------------------------------------------------
def _generator_kernel(x_ref, aux_ref, w_up1_ref, m_up_ref,
                      w_first_ref, b_first_ref,
                      w_gate_ref, b_gate_ref, w_os_ref, b_os_ref,
                      w_l0_ref, b_l0_ref, w_l1_ref, b_l1_ref, mask_ref,
                      o_ref, xpad_ref, aux_scr, skip_scr,
                      *, cfg, bb, dot_dtype, mxu_precision):
    f32 = jnp.float32
    c_aux = cfg.mel_dim + 2
    k1 = cfg.upsample_pad * 2 + 1
    mt = aux_ref.shape[-1]
    t = x_ref.shape[-1]
    t1 = mt - (k1 - 1)
    r = cfg.residual_channels
    g = cfg.gate_channels
    gh = g // 2
    k = cfg.kernel_size
    layers = cfg.blocks * cfg.stacks_in_block
    dilations = [2 ** si for _ in range(cfg.blocks)
                 for si in range(cfg.stacks_in_block)]
    pmax = (k - 1) // 2 * max(dilations)
    s_blk = t + 2 * pmax          # per-sequence stride in the packed buffers
    wp = bb * s_blk - 2 * pmax    # packed compute width (all dots run this wide)

    def mxu(a, b):                # bf16 operands, f32 accumulation (fast path)
        return jnp.dot(a.astype(dot_dtype), b.astype(dot_dtype),
                       preferred_element_type=f32, precision=mxu_precision)

    # ---- UpsampleNet -------------------------------------------------------
    # 'First' valid conv: K1 taps stacked along the contraction axis -> 1 dot.
    firsts = []
    for i in range(bb):
        aux_in = aux_ref[i].astype(f32)                            # [C_aux, MT]
        stk = jnp.concatenate([aux_in[:, tap:tap + t1] for tap in range(k1)],
                              axis=0)                              # [K1*C_aux, T1]
        firsts.append(mxu(w_up1_ref[...], stk))                    # [C_aux, T1]
    # All Stretch2d + Conv2d stages = one pre-folded [T1, T] time map, shared
    # by every sequence in the block -> a single MXU dot.
    aux_all = mxu(jnp.concatenate(firsts, axis=0), m_up_ref[...])  # [bb*C_aux, T]

    # Packed conditioning (zeros in the inter-sequence gap columns).
    aux_scr[...] = jnp.zeros((c_aux, wp), f32)
    for i in range(bb):
        aux_scr[:, i * s_blk:i * s_blk + t] = aux_all[i * c_aux:(i + 1) * c_aux]

    # ---- Generator 'First' 1x1 conv + packed residual stream ---------------
    # Only the pad / gap strips are zeroed; the centers are overwritten by h0.
    for i in range(bb):
        base = i * s_blk
        xpad_ref[:, base:base + pmax] = jnp.zeros((r, pmax), f32)
        xpad_ref[:, base + pmax + t:base + s_blk] = jnp.zeros((r, pmax), f32)
        h0 = w_first_ref[...] * x_ref[i].astype(f32) + b_first_ref[...]
        xpad_ref[:, base + pmax:base + pmax + t] = h0              # [R, T]

    # 1 on real sample columns, 0 on gap columns; sqrt(0.5) folded in, hoisted.
    mask_half = mask_ref[...] * math.sqrt(0.5)                     # [1, wp]

    # ---- ResConvGLU stacks --------------------------------------------------
    # TODO(synk): Dropout (train-mode only) is omitted - inference forward.
    for l in range(layers):
        d = dilations[l]
        pad = (k - 1) // 2 * d
        # One deep dot per layer: K shifted residual slices + aux rows stacked
        # along the contraction axis against the fused [G, K*R+C_aux] weight.
        pieces = [xpad_ref[:, pmax + tap * d - pad:pmax + tap * d - pad + wp]
                  for tap in range(k)]
        pieces.append(aux_scr[...])
        gate = mxu(w_gate_ref[l], jnp.concatenate(pieces, axis=0)) + b_gate_ref[l]
        z = jnp.tanh(gate[:gh]) * jax.nn.sigmoid(gate[gh:])        # GLU [G/2, wp]

        # Fused residual ('Out') + 'Skip' projection: one [(R+SC), G/2] dot.
        os_ = mxu(w_os_ref[l], z) + b_os_ref[l]                    # [R+SC, wp]
        center = xpad_ref[:, pmax:pmax + wp]
        # Masked writeback keeps the inter-sequence gap columns at zero so
        # dilated taps never bleed across sequence boundaries.
        xpad_ref[:, pmax:pmax + wp] = (os_[:r] + center) * mask_half
        if l == 0:
            skip_scr[...] = os_[r:]
        else:
            skip_scr[...] = skip_scr[...] + os_[r:]

    # ---- 'Last' head (sqrt(1/L) already folded into the skip weights) ------
    hh = jnp.maximum(skip_scr[...], 0.0)
    hh = jnp.maximum(mxu(w_l0_ref[...], hh) + b_l0_ref[...], 0.0)
    logits = mxu(w_l1_ref[...], hh) + b_l1_ref[...]                # [1, wp]
    for i in range(bb):
        o_ref[i] = logits[:, i * s_blk:i * s_blk + t].astype(o_ref.dtype)


# ---------------------------------------------------------------------------
# Host-side helpers
# ---------------------------------------------------------------------------
def _stage_matrix(taps, t_in, scale):
    """Exact [t_in, t_in*scale] time map of Stretch2d(nearest, x`scale`) +
    Conv2d(1, 1, (1, 2*scale+1), padding=(0, scale), bias=False).
    Built with a scatter-add (no O(T^2 * s) one-hot)."""
    s = int(scale)
    t_out = t_in * s
    taps = taps.astype(jnp.float32)
    t_idx = jnp.arange(t_out)
    j_idx = jnp.arange(2 * s + 1)
    tp = t_idx[None, :] + j_idx[:, None] - s          # index into stretched signal
    q = jnp.floor_divide(tp, s)                       # source frame index
    valid = (q >= 0) & (q < t_in)
    rows = jnp.clip(q, 0, t_in - 1).reshape(-1)
    cols = jnp.broadcast_to(t_idx[None, :], q.shape).reshape(-1)
    vals = (taps[:, None] * valid.astype(jnp.float32)).reshape(-1)
    return jnp.zeros((t_in, t_out), jnp.float32).at[rows, cols].add(vals)


def generator_forward(x, mels, silences, pitches, params, cfg,
                      batch_block=1, dot_dtype=jnp.bfloat16):
    """x: [B, T], mels: [B, Mel, MT], silences/pitches: [B, MT] -> [B, T]."""
    f32 = jnp.float32
    b, t = x.shape
    assert b % batch_block == 0, 'batch must be divisible by batch_block'
    bb = batch_block
    c_aux = cfg.mel_dim + 2
    mt = mels.shape[-1]
    k1 = cfg.upsample_pad * 2 + 1
    t1 = mt - (k1 - 1)
    r = cfg.residual_channels
    g = cfg.gate_channels
    sc = cfg.skip_channels
    k = cfg.kernel_size
    layers = cfg.blocks * cfg.stacks_in_block
    pmax = (k - 1) // 2 * (2 ** (cfg.stacks_in_block - 1))
    s_blk = t + 2 * pmax
    wp = bb * s_blk - 2 * pmax
    hp = lax.Precision.HIGHEST

    aux = jnp.concatenate(
        [mels, silences[:, None, :].astype(f32),
         pitches[:, None, :].astype(f32)], axis=1)                 # [B, C_aux, MT]

    # ---- Host-side weight folding (tiny, exact) -----------------------------
    # UpsampleNet 'First': [K1, C_out, C_in] -> [C_out, K1*C_in] (tap-major).
    w_up1f = jnp.transpose(params['w_up1'], (1, 0, 2)).reshape(c_aux, k1 * c_aux)
    # All Stretch2d + Conv2d stages folded into ONE [T1, T] time map.
    # TODO(synk): at production audio lengths switch to a banded / in-kernel
    # upsample instead of a dense [T1, T] matmul operand.
    m_up = None
    t_cur = t1
    for scl, taps in zip(cfg.upsample_scales, params['up_taps']):
        stage = _stage_matrix(taps, t_cur, scl)
        m_up = stage if m_up is None else jnp.dot(m_up, stage, precision=hp)
        t_cur *= scl
    assert t_cur == t, 'audio length must equal upsampled aux length'
    # Per-layer gate weight: dilated-conv taps + aux 1x1 fused on contraction.
    w_gate = jnp.concatenate(
        [jnp.transpose(params['w_conv'], (0, 2, 1, 3)).reshape(layers, g, k * r),
         params['w_aux'].reshape(layers, g, c_aux)], axis=-1)      # [L,G,K*R+C_aux]
    # Fused residual ('Out') + 'Skip' projection, sqrt(1/L) folded into skip.
    skip_scale = math.sqrt(1.0 / layers)
    w_os = jnp.concatenate([params['w_out'], params['w_skip'] * skip_scale], axis=1)
    b_os = jnp.concatenate([params['b_out'], params['b_skip'] * skip_scale], axis=1)
    # Lane mask: 1 on real sample columns, 0 on inter-sequence gap columns.
    gapmask = ((jnp.arange(wp) % s_blk) < t).astype(f32)[None, :]  # [1, wp]

    cdt = dot_dtype
    weight_args = (w_up1f.astype(cdt), m_up.astype(cdt),
                   params['w_first'], params['b_first'],
                   w_gate.astype(cdt), params['b_conv'],
                   w_os.astype(cdt), b_os,
                   params['w_l0'].astype(cdt), params['b_l0'],
                   params['w_l1'].astype(cdt), params['b_l1'],
                   gapmask)

    def _resident(arr):                     # whole-array, VMEM-resident block
        nd = arr.ndim
        return pl.BlockSpec(arr.shape, lambda i, _n=nd: (0,) * _n)

    x3 = x[:, None, :]                                             # [B, 1, T]
    kernel = functools.partial(
        _generator_kernel, cfg=cfg, bb=bb, dot_dtype=cdt,
        mxu_precision=(hp if cdt == jnp.float32 else None))

    out = pl.pallas_call(
        kernel,
        out_shape=jax.ShapeDtypeStruct((b, 1, t), jnp.float32),
        grid=(b // bb,),
        in_specs=[pl.BlockSpec((bb, 1, t), lambda i: (i, 0, 0)),
                  pl.BlockSpec((bb, c_aux, mt), lambda i: (i, 0, 0))]
                 + [_resident(w) for w in weight_args],
        out_specs=pl.BlockSpec((bb, 1, t), lambda i: (i, 0, 0)),
        scratch_shapes=[pltpu.VMEM((r, bb * s_blk), f32),      # packed residual
                        pltpu.VMEM((c_aux, wp), f32),          # packed aux
                        pltpu.VMEM((sc, wp), f32)],            # skip accumulator
        compiler_params=pltpu.CompilerParams(
            dimension_semantics=("parallel",)),
    )(x3, aux, *weight_args)
    return out[:, 0, :]


def make_generator_params(key, cfg):
    """Deterministic init.  weight_norm at construction time is numerically a
    no-op (g = ||v||), so effective weights equal raw init weights; biases are
    zero, matching the module's reset_parameters."""
    f32 = jnp.float32
    c_aux = cfg.mel_dim + 2
    k1 = cfg.upsample_pad * 2 + 1
    r = cfg.residual_channels
    g = cfg.gate_channels
    gh = g // 2
    s = cfg.skip_channels
    k = cfg.kernel_size
    layers = cfg.blocks * cfg.stacks_in_block

    def uni(kk, shape, fan_in):
        bound = math.sqrt(6.0 / fan_in)          # kaiming/xavier-uniform-like
        return jax.random.uniform(kk, shape, f32, -bound, bound)

    keys = jax.random.split(key, 10)
    tap_keys = jax.random.split(keys[1], len(cfg.upsample_scales))
    return {
        'w_up1': uni(keys[0], (k1, c_aux, c_aux), c_aux * k1),
        'up_taps': [uni(kk, (2 * scl + 1,), 2 * (2 * scl + 1))
                    for kk, scl in zip(tap_keys, cfg.upsample_scales)],
        'w_first': uni(keys[2], (r, 1), 2),
        'b_first': jnp.zeros((r, 1), f32),
        'w_conv': uni(keys[3], (layers, k, g, r), r * k),   # [L, K, Cout, Cin]
        'b_conv': jnp.zeros((layers, g, 1), f32),
        'w_aux': uni(keys[4], (layers * g, c_aux), c_aux),
        'w_out': uni(keys[5], (layers, r, gh), gh),
        'b_out': jnp.zeros((layers, r, 1), f32),
        'w_skip': uni(keys[6], (layers, s, gh), gh),
        'b_skip': jnp.zeros((layers, s, 1), f32),
        'w_l0': uni(keys[7], (s, s), s),
        'b_l0': jnp.zeros((s, 1), f32),
        'w_l1': uni(keys[8], (1, s), s),
        'b_l1': jnp.zeros((1, 1), f32),
    }


def generator_reference(x, mels, silences, pitches, params, cfg,
                        dot_dtype=jnp.float32):
    """Pure-JAX reference mirroring the PyTorch forward (inference mode).
    `dot_dtype` only sets the matmul operand precision (bf16 mirrors the fast
    kernel path); structure follows the module layer-by-layer."""
    f32 = jnp.float32
    prec = lax.Precision.HIGHEST if dot_dtype == jnp.float32 else None

    def ein(eq, a, b_):
        return jnp.einsum(eq, a.astype(dot_dtype), b_.astype(dot_dtype),
                          preferred_element_type=f32, precision=prec)

    aux = jnp.concatenate([mels, silences[:, None, :].astype(f32),
                           pitches[:, None, :].astype(f32)], axis=1)
    k1 = cfg.upsample_pad * 2 + 1
    mt = aux.shape[-1]
    t1 = mt - (k1 - 1)
    a = jnp.zeros((aux.shape[0], aux.shape[1], t1), f32)
    for tap in range(k1):                                       # UpsampleNet.First
        a = a + ein('oc,bct->bot', params['w_up1'][tap], aux[:, :, tap:tap + t1])
    for scl, taps in zip(cfg.upsample_scales, params['up_taps']):
        a = jnp.repeat(a, scl, axis=-1)                         # Stretch2d (nearest)
        tn = a.shape[-1]
        ap = jnp.pad(a, ((0, 0), (0, 0), (scl, scl)))
        o = jnp.zeros_like(a)
        for j in range(2 * scl + 1):                            # Conv2d(1,1,(1,2s+1))
            o = o + taps[j] * ap[:, :, j:j + tn]
        a = o
    aux_up = a                                                  # [B, C_aux, T]

    t = x.shape[-1]
    g = cfg.gate_channels
    gh = g // 2
    k = cfg.kernel_size
    layers = cfg.blocks * cfg.stacks_in_block
    dilations = [2 ** si for _ in range(cfg.blocks)
                 for si in range(cfg.stacks_in_block)]

    h = params['w_first'][None] * x[:, None, :] + params['b_first'][None]
    skips = 0.0
    for l in range(layers):
        d = dilations[l]
        pad = (k - 1) // 2 * d
        hpd = jnp.pad(h, ((0, 0), (0, 0), (pad, pad)))
        conv = jnp.zeros((x.shape[0], g, t), f32)
        for tap in range(k):
            conv = conv + ein('gr,brt->bgt', params['w_conv'][l, tap],
                              hpd[:, :, tap * d:tap * d + t])
        gate = conv + params['b_conv'][l][None] \
             + ein('gc,bct->bgt', params['w_aux'][l * g:(l + 1) * g], aux_up)
        z = jnp.tanh(gate[:, :gh]) * jax.nn.sigmoid(gate[:, gh:])
        out = ein('rg,bgt->brt', params['w_out'][l], z) + params['b_out'][l][None]
        h = (out + h) * math.sqrt(0.5)
        skips = skips + ein('sg,bgt->bst', params['w_skip'][l], z) \
                      + params['b_skip'][l][None]
    skips = skips * math.sqrt(1.0 / layers)
    hh = jnp.maximum(skips, 0.0)
    hh = jnp.maximum(ein('os,bst->bot', params['w_l0'], hh)
                     + params['b_l0'][None], 0.0)
    logits = ein('os,bst->bot', params['w_l1'], hh) + params['b_l1'][None]
    return logits[:, 0, :]


if __name__ == "__main__":
    cfg = SimpleNamespace(
        mel_dim=6,                 # Sound.Mel_Dim        (aux channels = 6 + 2 = 8)
        upsample_pad=2,            # Generator.Upsample.Pad
        upsample_scales=(2, 2),    # Generator.Upsample.Scales (total hop = 4)
        residual_channels=8,       # Generator.Residual_Channels
        gate_channels=16,          # Generator.ResConvGLU.Gate_Channels
        skip_channels=8,           # Generator.ResConvGLU.Skip_Channels
        blocks=2,                  # Generator.ResConvGLU.Blocks
        stacks_in_block=2,         # Generator.ResConvGLU.Stacks_in_Block
        kernel_size=3,             # Generator.ResConvGLU.Kernel_Size
    )
    batch = 4
    batch_block = 2                # 2 sequences lane-packed per step; grid=(2,)
    mel_time = 36
    t_audio = mel_time - 2 * cfg.upsample_pad
    for scl in cfg.upsample_scales:
        t_audio *= scl                              # (36 - 4) * 4 = 128

    key = jax.random.PRNGKey(0)
    k_x, k_mel, k_sil, k_pitch, k_par = jax.random.split(key, 5)
    x = jax.random.normal(k_x, (batch, t_audio), jnp.float32)
    mels = jax.random.normal(k_mel, (batch, cfg.mel_dim, mel_time), jnp.float32)
    silences = jax.random.randint(k_sil, (batch, mel_time), 0, 2)   # LongTensor-like
    pitches = jax.random.normal(k_pitch, (batch, mel_time), jnp.float32)

    params = make_generator_params(k_par, cfg)

    # Fast path: bf16 MXU operands, f32 accumulation, lane-packed batch.
    out = generator_forward(x, mels, silences, pitches, params, cfg,
                            batch_block=batch_block, dot_dtype=jnp.bfloat16)
    out = jax.block_until_ready(out)
    assert out.shape == (batch, t_audio)
    assert bool(jnp.all(jnp.isfinite(out)))

    # Precision-verification path: same kernel with f32/HIGHEST dots -> tight
    # check that all the folding / fusion / lane-packing is exact.
    out_f32 = generator_forward(x, mels, silences, pitches, params, cfg,
                                batch_block=batch_block, dot_dtype=jnp.float32)
    out_f32 = jax.block_until_ready(out_f32)

    ref_f32 = generator_reference(x, mels, silences, pitches, params, cfg)
    ref_bf16 = generator_reference(x, mels, silences, pitches, params, cfg,
                                   dot_dtype=jnp.bfloat16)
    assert jnp.allclose(out_f32, ref_f32, atol=5e-3, rtol=5e-3), \
        float(jnp.max(jnp.abs(out_f32 - ref_f32)))
    # bf16 path vs a bf16-matmul reference (tolerance covers bf16 rounding).
    assert jnp.allclose(out, ref_bf16, atol=1e-1, rtol=1e-1), \
        float(jnp.max(jnp.abs(out - ref_bf16)))
    print("KERNEL_OK")
</pallas_src>

<mosaic_0001>
module attributes {stable_mosaic.version = 11 : i64} {
  func.func @_generator_kernel(%arg0: i32, %arg1: memref<2x1x128xf32, #tpu.memory_space<vmem>>, %arg2: memref<2x8x36xf32, #tpu.memory_space<vmem>>, %arg3: memref<8x40xbf16, #tpu.memory_space<vmem>>, %arg4: memref<32x128xbf16, #tpu.memory_space<vmem>>, %arg5: memref<8x1xf32, #tpu.memory_space<vmem>>, %arg6: memref<8x1xf32, #tpu.memory_space<vmem>>, %arg7: memref<4x16x32xbf16, #tpu.memory_space<vmem>>, %arg8: memref<4x16x1xf32, #tpu.memory_space<vmem>>, %arg9: memref<4x16x8xbf16, #tpu.memory_space<vmem>>, %arg10: memref<4x16x1xf32, #tpu.memory_space<vmem>>, %arg11: memref<8x8xbf16, #tpu.memory_space<vmem>>, %arg12: memref<8x1xf32, #tpu.memory_space<vmem>>, %arg13: memref<1x8xbf16, #tpu.memory_space<vmem>>, %arg14: memref<1x1xf32, #tpu.memory_space<vmem>>, %arg15: memref<1x260xf32, #tpu.memory_space<vmem>>, %arg16: memref<2x1x128xf32, #tpu.memory_space<vmem>>, %arg17: memref<8x264xf32, #tpu.memory_space<vmem>>, %arg18: memref<8x260xf32, #tpu.memory_space<vmem>>, %arg19: memref<8x260xf32, #tpu.memory_space<vmem>>) attributes {dimension_semantics = [#tpu.dimension_semantics<parallel>], iteration_bounds = array<i64: 2>, scalar_prefetch = 0 : i64, scratch_operands = 3 : i64, tpu.core_type = #tpu.core_type<tc>, window_params = [{transform_indices = @transform_0, window_bounds = array<i64: 2, 1, 128>}, {transform_indices = @transform_1, window_bounds = array<i64: 2, 8, 36>}, {pipeline_mode = #tpu.pipeline_mode<synchronous>, transform_indices = @transform_2, window_bounds = array<i64: 8, 40>}, {pipeline_mode = #tpu.pipeline_mode<synchronous>, transform_indices = @transform_3, window_bounds = array<i64: 32, 128>}, {pipeline_mode = #tpu.pipeline_mode<synchronous>, transform_indices = @transform_4, window_bounds = array<i64: 8, 1>}, {pipeline_mode = #tpu.pipeline_mode<synchronous>, transform_indices = @transform_5, window_bounds = array<i64: 8, 1>}, {pipeline_mode = #tpu.pipeline_mode<synchronous>, transform_indices = @transform_6, window_bounds = array<i64: 4, 16, 32>}, {pipeline_mode = #tpu.pipeline_mode<synchronous>, transform_indices = @transform_7, window_bounds = array<i64: 4, 16, 1>}, {pipeline_mode = #tpu.pipeline_mode<synchronous>, transform_indices = @transform_8, window_bounds = array<i64: 4, 16, 8>}, {pipeline_mode = #tpu.pipeline_mode<synchronous>, transform_indices = @transform_9, window_bounds = array<i64: 4, 16, 1>}, {pipeline_mode = #tpu.pipeline_mode<synchronous>, transform_indices = @transform_10, window_bounds = array<i64: 8, 8>}, {pipeline_mode = #tpu.pipeline_mode<synchronous>, transform_indices = @transform_11, window_bounds = array<i64: 8, 1>}, {pipeline_mode = #tpu.pipeline_mode<synchronous>, transform_indices = @transform_12, window_bounds = array<i64: 1, 8>}, {pipeline_mode = #tpu.pipeline_mode<synchronous>, transform_indices = @transform_13, window_bounds = array<i64: 1, 1>}, {pipeline_mode = #tpu.pipeline_mode<synchronous>, transform_indices = @transform_14, window_bounds = array<i64: 1, 260>}, {transform_indices = @transform_15, window_bounds = array<i64: 2, 1, 128>}]} {
    %c0 = arith.constant 0 : index
    %c0_0 = arith.constant 0 : index
    %c0_1 = arith.constant 0 : index
    %0 = vector.load %arg2[%c0, %c0_0, %c0_1] : memref<2x8x36xf32, #tpu.memory_space<vmem>>, vector<1x8x36xf32>
    %1 = vector.shape_cast %0 : vector<1x8x36xf32> to vector<8x36xf32>
    %2 = vector.extract_strided_slice %1 {offsets = [0, 0], sizes = [8, 32], strides = [1, 1]} : vector<8x36xf32> to vector<8x32xf32>
    %3 = vector.extract_strided_slice %1 {offsets = [0, 1], sizes = [8, 32], strides = [1, 1]} : vector<8x36xf32> to vector<8x32xf32>
    %4 = vector.extract_strided_slice %1 {offsets = [0, 2], sizes = [8, 32], strides = [1, 1]} : vector<8x36xf32> to vector<8x32xf32>
    %5 = vector.extract_strided_slice %1 {offsets = [0, 3], sizes = [8, 32], strides = [1, 1]} : vector<8x36xf32> to vector<8x32xf32>
    %6 = vector.extract_strided_slice %1 {offsets = [0, 4], sizes = [8, 32], strides = [1, 1]} : vector<8x36xf32> to vector<8x32xf32>
    %7 = tpu.concatenate %2, %3, %4, %5, %6 in 0 : vector<8x32xf32>, vector<8x32xf32>, vector<8x32xf32>, vector<8x32xf32>, vector<8x32xf32> -> vector<40x32xf32>
    %c0_2 = arith.constant 0 : index
    %c0_3 = arith.constant 0 : index
    %8 = vector.load %arg3[%c0_2, %c0_3] : memref<8x40xbf16, #tpu.memory_space<vmem>>, vector<8x40xbf16>
    %9 = arith.truncf %7 : vector<40x32xf32> to vector<40x32xbf16>
    %cst = arith.constant dense<0.000000e+00> : vector<8x32xf32>
    %10 = tpu.matmul %8, %9, %cst {dimension_numbers = #tpu.dot_dimension_numbers<[1], [0], [0], [1], [0, 0, 1, 1], [], []>} : vector<8x40xbf16>, vector<40x32xbf16>, vector<8x32xf32> -> vector<8x32xf32>
    %c1 = arith.constant 1 : index
    %c0_4 = arith.constant 0 : index
    %c0_5 = arith.constant 0 : index
    %11 = vector.load %arg2[%c1, %c0_4, %c0_5] : memref<2x8x36xf32, #tpu.memory_space<vmem>>, vector<1x8x36xf32>
    %12 = vector.shape_cast %11 : vector<1x8x36xf32> to vector<8x36xf32>
    %13 = vector.extract_strided_slice %12 {offsets = [0, 0], sizes = [8, 32], strides = [1, 1]} : vector<8x36xf32> to vector<8x32xf32>
    %14 = vector.extract_strided_slice %12 {offsets = [0, 1], sizes = [8, 32], strides = [1, 1]} : vector<8x36xf32> to vector<8x32xf32>
    %15 = vector.extract_strided_slice %12 {offsets = [0, 2], sizes = [8, 32], strides = [1, 1]} : vector<8x36xf32> to vector<8x32xf32>
    %16 = vector.extract_strided_slice %12 {offsets = [0, 3], sizes = [8, 32], strides = [1, 1]} : vector<8x36xf32> to vector<8x32xf32>
    %17 = vector.extract_strided_slice %12 {offsets = [0, 4], sizes = [8, 32], strides = [1, 1]} : vector<8x36xf32> to vector<8x32xf32>
    %18 = tpu.concatenate %13, %14, %15, %16, %17 in 0 : vector<8x32xf32>, vector<8x32xf32>, vector<8x32xf32>, vector<8x32xf32>, vector<8x32xf32> -> vector<40x32xf32>
    %c0_6 = arith.constant 0 : index
    %c0_7 = arith.constant 0 : index
    %19 = vector.load %arg3[%c0_6, %c0_7] : memref<8x40xbf16, #tpu.memory_space<vmem>>, vector<8x40xbf16>
    %20 = arith.truncf %18 : vector<40x32xf32> to vector<40x32xbf16>
    %cst_8 = arith.constant dense<0.000000e+00> : vector<8x32xf32>
    %21 = tpu.matmul %19, %20, %cst_8 {dimension_numbers = #tpu.dot_dimension_numbers<[1], [0], [0], [1], [0, 0, 1, 1], [], []>} : vector<8x40xbf16>, vector<40x32xbf16>, vector<8x32xf32> -> vector<8x32xf32>
    %22 = tpu.concatenate %10, %21 in 0 : vector<8x32xf32>, vector<8x32xf32> -> vector<16x32xf32>
    %c0_9 = arith.constant 0 : index
    %c0_10 = arith.constant 0 : index
    %23 = vector.load %arg4[%c0_9, %c0_10] : memref<32x128xbf16, #tpu.memory_space<vmem>>, vector<32x128xbf16>
    %24 = arith.truncf %22 : vector<16x32xf32> to vector<16x32xbf16>
    %cst_11 = arith.constant dense<0.000000e+00> : vector<16x128xf32>
    %25 = tpu.matmul %24, %23, %cst_11 {dimension_numbers = #tpu.dot_dimension_numbers<[1], [0], [0], [1], [0, 0, 1, 1], [], []>} : vector<16x32xbf16>, vector<32x128xbf16>, vector<16x128xf32> -> vector<16x128xf32>
    %cst_12 = arith.constant 0.000000e+00 : f32
    %26 = vector.broadcast %cst_12 : f32 to vector<8x260xf32>
    %c0_13 = arith.constant 0 : index
    %c0_14 = arith.constant 0 : index
    %27 = vector.load %arg18[%c0_13, %c0_14] : memref<8x260xf32, #tpu.memory_space<vmem>>, vector<8x260xf32>
    tpu.vector_store %arg18[%c0_13, %c0_14], %26 {strides = array<i32>} : memref<8x260xf32, #tpu.memory_space<vmem>>, vector<8x260xf32>,
    %28 = vector.extract_strided_slice %25 {offsets = [0, 0], sizes = [8, 128], strides = [1, 1]} : vector<16x128xf32> to vector<8x128xf32>
    %c0_15 = arith.constant 0 : index
    %c0_16 = arith.constant 0 : index
    %29 = vector.load %arg18[%c0_15, %c0_16] : memref<8x260xf32, #tpu.memory_space<vmem>>, vector<8x128xf32>
    tpu.vector_store %arg18[%c0_15, %c0_16], %28 {strides = array<i32>} : memref<8x260xf32, #tpu.memory_space<vmem>>, vector<8x128xf32>,
    %30 = vector.extract_strided_slice %25 {offsets = [8, 0], sizes = [8, 128], strides = [1, 1]} : vector<16x128xf32> to vector<8x128xf32>
    %c0_17 = arith.constant 0 : index
    %c132 = arith.constant 132 : index
    %31 = vector.load %arg18[%c0_17, %c132] : memref<8x260xf32, #tpu.memory_space<vmem>>, vector<8x128xf32>
    tpu.vector_store %arg18[%c0_17, %c132], %30 {strides = array<i32>} : memref<8x260xf32, #tpu.memory_space<vmem>>, vector<8x128xf32>,
    %cst_18 = arith.constant 0.000000e+00 : f32
    %32 = vector.broadcast %cst_18 : f32 to vector<8x2xf32>
    %c0_19 = arith.constant 0 : index
    %c0_20 = arith.constant 0 : index
    %33 = vector.load %arg17[%c0_19, %c0_20] : memref<8x264xf32, #tpu.memory_space<vmem>>, vector<8x2xf32>
    tpu.vector_store %arg17[%c0_19, %c0_20], %32 {strides = array<i32>} : memref<8x264xf32, #tpu.memory_space<vmem>>, vector<8x2xf32>,
    %cst_21 = arith.constant 0.000000e+00 : f32
    %34 = vector.broadcast %cst_21 : f32 to vector<8x2xf32>
    %c0_22 = arith.constant 0 : index
    %c130 = arith.constant 130 : index
    %35 = vector.load %arg17[%c0_22, %c130] : memref<8x264xf32, #tpu.memory_space<vmem>>, vector<8x2xf32>
    tpu.vector_store %arg17[%c0_22, %c130], %34 {strides = array<i32>} : memref<8x264xf32, #tpu.memory_space<vmem>>, vector<8x2xf32>,
    %c0_23 = arith.constant 0 : index
    %c0_24 = arith.constant 0 : index
    %36 = vector.load %arg5[%c0_23, %c0_24] : memref<8x1xf32, #tpu.memory_space<vmem>>, vector<8x1xf32>
    %c0_25 = arith.constant 0 : index
    %c0_26 = arith.constant 0 : index
    %c0_27 = arith.constant 0 : index
    %37 = vector.load %arg1[%c0_25, %c0_26, %c0_27] : memref<2x1x128xf32, #tpu.memory_space<vmem>>, vector<1x1x128xf32>
    %38 = vector.shape_cast %37 : vector<1x1x128xf32> to vector<1x128xf32>
    %39 = vector.broadcast %36 : vector<8x1xf32> to vector<8x128xf32>
    %40 = vector.broadcast %38 : vector<1x128xf32> to vector<8x128xf32>
    %41 = arith.mulf %39, %40 : vector<8x128xf32>
    %c0_28 = arith.constant 0 : index
    %c0_29 = arith.constant 0 : index
    %42 = vector.load %arg6[%c0_28, %c0_29] : memref<8x1xf32, #tpu.memory_space<vmem>>, vector<8x1xf32>
    %43 = vector.broadcast %42 : vector<8x1xf32> to vector<8x128xf32>
    %44 = arith.addf %41, %43 : vector<8x128xf32>
    %c0_30 = arith.constant 0 : index
    %c2 = arith.constant 2 : index
    %45 = vector.load %arg17[%c0_30, %c2] : memref<8x264xf32, #tpu.memory_space<vmem>>, vector<8x128xf32>
    tpu.vector_store %arg17[%c0_30, %c2], %44 {strides = array<i32>} : memref<8x264xf32, #tpu.memory_space<vmem>>, vector<8x128xf32>,
    %cst_31 = arith.constant 0.000000e+00 : f32
    %46 = vector.broadcast %cst_31 : f32 to vector<8x2xf32>
    %c0_32 = arith.constant 0 : index
    %c132_33 = arith.constant 132 : index
    %47 = vector.load %arg17[%c0_32, %c132_33] : memref<8x264xf32, #tpu.memory_space<vmem>>, vector<8x2xf32>
    tpu.vector_store %arg17[%c0_32, %c132_33], %46 {strides = array<i32>} : memref<8x264xf32, #tpu.memory_space<vmem>>, vector<8x2xf32>,
    %cst_34 = arith.constant 0.000000e+00 : f32
    %48 = vector.broadcast %cst_34 : f32 to vector<8x2xf32>
    %c0_35 = arith.constant 0 : index
    %c262 = arith.constant 262 : index
    %49 = vector.load %arg17[%c0_35, %c262] : memref<8x264xf32, #tpu.memory_space<vmem>>, vector<8x2xf32>
    tpu.vector_store %arg17[%c0_35, %c262], %48 {strides = array<i32>} : memref<8x264xf32, #tpu.memory_space<vmem>>, vector<8x2xf32>,
    %c0_36 = arith.constant 0 : index
    %c0_37 = arith.constant 0 : index
    %50 = vector.load %arg5[%c0_36, %c0_37] : memref<8x1xf32, #tpu.memory_space<vmem>>, vector<8x1xf32>
    %c1_38 = arith.constant 1 : index
    %c0_39 = arith.constant 0 : index
    %c0_40 = arith.constant 0 : index
    %51 = vector.load %arg1[%c1_38, %c0_39, %c0_40] : memref<2x1x128xf32, #tpu.memory_space<vmem>>, vector<1x1x128xf32>
    %52 = vector.shape_cast %51 : vector<1x1x128xf32> to vector<1x128xf32>
    %53 = vector.broadcast %50 : vector<8x1xf32> to vector<8x128xf32>
    %54 = vector.broadcast %52 : vector<1x128xf32> to vector<8x128xf32>
    %55 = arith.mulf %53, %54 : vector<8x128xf32>
    %c0_41 = arith.constant 0 : index
    %c0_42 = arith.constant 0 : index
    %56 = vector.load %arg6[%c0_41, %c0_42] : memref<8x1xf32, #tpu.memory_space<vmem>>, vector<8x1xf32>
    %57 = vector.broadcast %56 : vector<8x1xf32> to vector<8x128xf32>
    %58 = arith.addf %55, %57 : vector<8x128xf32>
    %c0_43 = arith.constant 0 : index
    %c134 = arith.constant 134 : index
    %59 = vector.load %arg17[%c0_43, %c134] : memref<8x264xf32, #tpu.memory_space<vmem>>, vector<8x128xf32>
    tpu.vector_store %arg17[%c0_43, %c134], %58 {strides = array<i32>} : memref<8x264xf32, #tpu.memory_space<vmem>>, vector<8x128xf32>,
    %c0_44 = arith.constant 0 : index
    %c0_45 = arith.constant 0 : index
    %60 = vector.load %arg15[%c0_44, %c0_45] : memref<1x260xf32, #tpu.memory_space<vmem>>, vector<1x260xf32>
    %cst_46 = arith.constant 0.707106769 : f32
    %61 = vector.broadcast %cst_46 : f32 to vector<1x260xf32>
    %62 = arith.mulf %60, %61 : vector<1x260xf32>
    %c0_47 = arith.constant 0 : index
    %c1_48 = arith.constant 1 : index
    %63 = vector.load %arg17[%c0_47, %c1_48] : memref<8x264xf32, #tpu.memory_space<vmem>>, vector<8x260xf32>
    %c0_49 = arith.constant 0 : index
    %c2_50 = arith.constant 2 : index
    %64 = vector.load %arg17[%c0_49, %c2_50] : memref<8x264xf32, #tpu.memory_space<vmem>>, vector<8x260xf32>
    %c0_51 = arith.constant 0 : index
    %c3 = arith.constant 3 : index
    %65 = vector.load %arg17[%c0_51, %c3] : memref<8x264xf32, #tpu.memory_space<vmem>>, vector<8x260xf32>
    %c0_52 = arith.constant 0 : index
    %c0_53 = arith.constant 0 : index
    %66 = vector.load %arg18[%c0_52, %c0_53] : memref<8x260xf32, #tpu.memory_space<vmem>>, vector<8x260xf32>
    %c0_54 = arith.constant 0 : index
    %c0_55 = arith.constant 0 : index
    %c0_56 = arith.constant 0 : index
    %67 = vector.load %arg7[%c0_54, %c0_55, %c0_56] : memref<4x16x32xbf16, #tpu.memory_space<vmem>>, vector<1x16x32xbf16>
    %68 = vector.shape_cast %67 : vector<1x16x32xbf16> to vector<16x32xbf16>
    %69 = tpu.concatenate %63, %64, %65, %66 in 0 : vector<8x260xf32>, vector<8x260xf32>, vector<8x260xf32>, vector<8x260xf32> -> vector<32x260xf32>
    %70 = arith.truncf %69 : vector<32x260xf32> to vector<32x260xbf16>
    %cst_57 = arith.constant dense<0.000000e+00> : vector<16x260xf32>
    %71 = tpu.matmul %68, %70, %cst_57 {dimension_numbers = #tpu.dot_dimension_numbers<[1], [0], [0], [1], [0, 0, 1, 1], [], []>} : vector<16x32xbf16>, vector<32x260xbf16>, vector<16x260xf32> -> vector<16x260xf32>
    %c0_58 = arith.constant 0 : index
    %c0_59 = arith.constant 0 : index
    %c0_60 = arith.constant 0 : index
    %72 = vector.load %arg8[%c0_58, %c0_59, %c0_60] : memref<4x16x1xf32, #tpu.memory_space<vmem>>, vector<1x16x1xf32>
    %73 = vector.shape_cast %72 : vector<1x16x1xf32> to vector<16x1xf32>
    %74 = vector.broadcast %73 : vector<16x1xf32> to vector<16x260xf32>
    %75 = arith.addf %71, %74 : vector<16x260xf32>
    %76 = vector.extract_strided_slice %75 {offsets = [0, 0], sizes = [8, 260], strides = [1, 1]} : vector<16x260xf32> to vector<8x260xf32>
    %77 = math.tanh %76 : vector<8x260xf32>
    %78 = vector.extract_strided_slice %75 {offsets = [8, 0], sizes = [8, 260], strides = [1, 1]} : vector<16x260xf32> to vector<8x260xf32>
    %79 = arith.negf %78 : vector<8x260xf32>
    %80 = math.exp %79 : vector<8x260xf32>
    %cst_61 = arith.constant 1.000000e+00 : f32
    %81 = vector.broadcast %cst_61 : f32 to vector<8x260xf32>
    %82 = arith.addf %81, %80 : vector<8x260xf32>
    %83 = arith.divf %81, %82 : vector<8x260xf32>
    %84 = arith.mulf %77, %83 : vector<8x260xf32>
    %c0_62 = arith.constant 0 : index
    %c0_63 = arith.constant 0 : index
    %c0_64 = arith.constant 0 : index
    %85 = vector.load %arg9[%c0_62, %c0_63, %c0_64] : memref<4x16x8xbf16, #tpu.memory_space<vmem>>, vector<1x16x8xbf16>
    %86 = vector.shape_cast %85 : vector<1x16x8xbf16> to vector<16x8xbf16>
    %87 = arith.truncf %84 : vector<8x260xf32> to vector<8x260xbf16>
    %cst_65 = arith.constant dense<0.000000e+00> : vector<16x260xf32>
    %88 = tpu.matmul %86, %87, %cst_65 {dimension_numbers = #tpu.dot_dimension_numbers<[1], [0], [0], [1], [0, 0, 1, 1], [], []>} : vector<16x8xbf16>, vector<8x260xbf16>, vector<16x260xf32> -> vector<16x260xf32>
    %c0_66 = arith.constant 0 : index
    %c0_67 = arith.constant 0 : index
    %c0_68 = arith.constant 0 : index
    %89 = vector.load %arg10[%c0_66, %c0_67, %c0_68] : memref<4x16x1xf32, #tpu.memory_space<vmem>>, vector<1x16x1xf32>
    %90 = vector.shape_cast %89 : vector<1x16x1xf32> to vector<16x1xf32>
    %91 = vector.broadcast %90 : vector<16x1xf32> to vector<16x260xf32>
    %92 = arith.addf %88, %91 : vector<16x260xf32>
    %c0_69 = arith.constant 0 : index
    %c2_70 = arith.constant 2 : index
    %93 = vector.load %arg17[%c0_69, %c2_70] : memref<8x264xf32, #tpu.memory_space<vmem>>, vector<8x260xf32>
    %94 = vector.extract_strided_slice %92 {offsets = [0, 0], sizes = [8, 260], strides = [1, 1]} : vector<16x260xf32> to vector<8x260xf32>
    %95 = arith.addf %94, %93 : vector<8x260xf32>
    %96 = vector.broadcast %62 : vector<1x260xf32> to vector<8x260xf32>
    %97 = arith.mulf %95, %96 : vector<8x260xf32>
    %c0_71 = arith.constant 0 : index
    %c2_72 = arith.constant 2 : index
    %98 = vector.load %arg17[%c0_71, %c2_72] : memref<8x264xf32, #tpu.memory_space<vmem>>, vector<8x260xf32>
    tpu.vector_store %arg17[%c0_71, %c2_72], %97 {strides = array<i32>} : memref<8x264xf32, #tpu.memory_space<vmem>>, vector<8x260xf32>,
    %99 = vector.extract_strided_slice %92 {offsets = [8, 0], sizes = [8, 260], strides = [1, 1]} : vector<16x260xf32> to vector<8x260xf32>
    %c0_73 = arith.constant 0 : index
    %c0_74 = arith.constant 0 : index
    %100 = vector.load %arg19[%c0_73, %c0_74] : memref<8x260xf32, #tpu.memory_space<vmem>>, vector<8x260xf32>
    tpu.vector_store %arg19[%c0_73, %c0_74], %99 {strides = array<i32>} : memref<8x260xf32, #tpu.memory_space<vmem>>, vector<8x260xf32>,
    %c0_75 = arith.constant 0 : index
    %c0_76 = arith.constant 0 : index
    %101 = vector.load %arg17[%c0_75, %c0_76] : memref<8x264xf32, #tpu.memory_space<vmem>>, vector<8x260xf32>
    %c0_77 = arith.constant 0 : index
    %c2_78 = arith.constant 2 : index
    %102 = vector.load %arg17[%c0_77, %c2_78] : memref<8x264xf32, #tpu.memory_space<vmem>>, vector<8x260xf32>
    %c0_79 = arith.constant 0 : index
    %c4 = arith.constant 4 : index
    %103 = vector.load %arg17[%c0_79, %c4] : memref<8x264xf32, #tpu.memory_space<vmem>>, vector<8x260xf32>
    %c0_80 = arith.constant 0 : index
    %c0_81 = arith.constant 0 : index
    %104 = vector.load %arg18[%c0_80, %c0_81] : memref<8x260xf32, #tpu.memory_space<vmem>>, vector<8x260xf32>
    %c1_82 = arith.constant 1 : index
    %c0_83 = arith.constant 0 : index
    %c0_84 = arith.constant 0 : index
    %105 = vector.load %arg7[%c1_82, %c0_83, %c0_84] : memref<4x16x32xbf16, #tpu.memory_space<vmem>>, vector<1x16x32xbf16>
    %106 = vector.shape_cast %105 : vector<1x16x32xbf16> to vector<16x32xbf16>
    %107 = tpu.concatenate %101, %102, %103, %104 in 0 : vector<8x260xf32>, vector<8x260xf32>, vector<8x260xf32>, vector<8x260xf32> -> vector<32x260xf32>
    %108 = arith.truncf %107 : vector<32x260xf32> to vector<32x260xbf16>
    %cst_85 = arith.constant dense<0.000000e+00> : vector<16x260xf32>
    %109 = tpu.matmul %106, %108, %cst_85 {dimension_numbers = #tpu.dot_dimension_numbers<[1], [0], [0], [1], [0, 0, 1, 1], [], []>} : vector<16x32xbf16>, vector<32x260xbf16>, vector<16x260xf32> -> vector<16x260xf32>
    %c1_86 = arith.constant 1 : index
    %c0_87 = arith.constant 0 : index
    %c0_88 = arith.constant 0 : index
    %110 = vector.load %arg8[%c1_86, %c0_87, %c0_88] : memref<4x16x1xf32, #tpu.memory_space<vmem>>, vector<1x16x1xf32>
    %111 = vector.shape_cast %110 : vector<1x16x1xf32> to vector<16x1xf32>
    %112 = vector.broadcast %111 : vector<16x1xf32> to vector<16x260xf32>
    %113 = arith.addf %109, %112 : vector<16x260xf32>
    %114 = vector.extract_strided_slice %113 {offsets = [0, 0], sizes = [8, 260], strides = [1, 1]} : vector<16x260xf32> to vector<8x260xf32>
    %115 = math.tanh %114 : vector<8x260xf32>
    %116 = vector.extract_strided_slice %113 {offsets = [8, 0], sizes = [8, 260], strides = [1, 1]} : vector<16x260xf32> to vector<8x260xf32>
    %117 = arith.negf %116 : vector<8x260xf32>
    %118 = math.exp %117 : vector<8x260xf32>
    %cst_89 = arith.constant 1.000000e+00 : f32
    %119 = vector.broadcast %cst_89 : f32 to vector<8x260xf32>
    %120 = arith.addf %119, %118 : vector<8x260xf32>
    %121 = arith.divf %119, %120 : vector<8x260xf32>
    %122 = arith.mulf %115, %121 : vector<8x260xf32>
    %c1_90 = arith.constant 1 : index
    %c0_91 = arith.constant 0 : index
    %c0_92 = arith.constant 0 : index
    %123 = vector.load %arg9[%c1_90, %c0_91, %c0_92] : memref<4x16x8xbf16, #tpu.memory_space<vmem>>, vector<1x16x8xbf16>
    %124 = vector.shape_cast %123 : vector<1x16x8xbf16> to vector<16x8xbf16>
    %125 = arith.truncf %122 : vector<8x260xf32> to vector<8x260xbf16>
    %cst_93 = arith.constant dense<0.000000e+00> : vector<16x260xf32>
    %126 = tpu.matmul %124, %125, %cst_93 {dimension_numbers = #tpu.dot_dimension_numbers<[1], [0], [0], [1], [0, 0, 1, 1], [], []>} : vector<16x8xbf16>, vector<8x260xbf16>, vector<16x260xf32> -> vector<16x260xf32>
    %c1_94 = arith.constant 1 : index
    %c0_95 = arith.constant 0 : index
    %c0_96 = arith.constant 0 : index
    %127 = vector.load %arg10[%c1_94, %c0_95, %c0_96] : memref<4x16x1xf32, #tpu.memory_space<vmem>>, vector<1x16x1xf32>
    %128 = vector.shape_cast %127 : vector<1x16x1xf32> to vector<16x1xf32>
    %129 = vector.broadcast %128 : vector<16x1xf32> to vector<16x260xf32>
    %130 = arith.addf %126, %129 : vector<16x260xf32>
    %c0_97 = arith.constant 0 : index
    %c2_98 = arith.constant 2 : index
    %131 = vector.load %arg17[%c0_97, %c2_98] : memref<8x264xf32, #tpu.memory_space<vmem>>, vector<8x260xf32>
    %132 = vector.extract_strided_slice %130 {offsets = [0, 0], sizes = [8, 260], strides = [1, 1]} : vector<16x260xf32> to vector<8x260xf32>
    %133 = arith.addf %132, %131 : vector<8x260xf32>
    %134 = vector.broadcast %62 : vector<1x260xf32> to vector<8x260xf32>
    %135 = arith.mulf %133, %134 : vector<8x260xf32>
    %c0_99 = arith.constant 0 : index
    %c2_100 = arith.constant 2 : index
    %136 = vector.load %arg17[%c0_99, %c2_100] : memref<8x264xf32, #tpu.memory_space<vmem>>, vector<8x260xf32>
    tpu.vector_store %arg17[%c0_99, %c2_100], %135 {strides = array<i32>} : memref<8x264xf32, #tpu.memory_space<vmem>>, vector<8x260xf32>,
    %c0_101 = arith.constant 0 : index
    %c0_102 = arith.constant 0 : index
    %137 = vector.load %arg19[%c0_101, %c0_102] : memref<8x260xf32, #tpu.memory_space<vmem>>, vector<8x260xf32>
    %138 = vector.extract_strided_slice %130 {offsets = [8, 0], sizes = [8, 260], strides = [1, 1]} : vector<16x260xf32> to vector<8x260xf32>
    %139 = arith.addf %137, %138 : vector<8x260xf32>
    %c0_103 = arith.constant 0 : index
    %c0_104 = arith.constant 0 : index
    %140 = vector.load %arg19[%c0_103, %c0_104] : memref<8x260xf32, #tpu.memory_space<vmem>>, vector<8x260xf32>
    tpu.vector_store %arg19[%c0_103, %c0_104], %139 {strides = array<i32>} : memref<8x260xf32, #tpu.memory_space<vmem>>, vector<8x260xf32>,
    %c0_105 = arith.constant 0 : index
    %c1_106 = arith.constant 1 : index
    %141 = vector.load %arg17[%c0_105, %c1_106] : memref<8x264xf32, #tpu.memory_space<vmem>>, vector<8x260xf32>
    %c0_107 = arith.constant 0 : index
    %c2_108 = arith.constant 2 : index
    %142 = vector.load %arg17[%c0_107, %c2_108] : memref<8x264xf32, #tpu.memory_space<vmem>>, vector<8x260xf32>
    %c0_109 = arith.constant 0 : index
    %c3_110 = arith.constant 3 : index
    %143 = vector.load %arg17[%c0_109, %c3_110] : memref<8x264xf32, #tpu.memory_space<vmem>>, vector<8x260xf32>
    %c0_111 = arith.constant 0 : index
    %c0_112 = arith.constant 0 : index
    %144 = vector.load %arg18[%c0_111, %c0_112] : memref<8x260xf32, #tpu.memory_space<vmem>>, vector<8x260xf32>
    %c2_113 = arith.constant 2 : index
    %c0_114 = arith.constant 0 : index
    %c0_115 = arith.constant 0 : index
    %145 = vector.load %arg7[%c2_113, %c0_114, %c0_115] : memref<4x16x32xbf16, #tpu.memory_space<vmem>>, vector<1x16x32xbf16>
    %146 = vector.shape_cast %145 : vector<1x16x32xbf16> to vector<16x32xbf16>
    %147 = tpu.concatenate %141, %142, %143, %144 in 0 : vector<8x260xf32>, vector<8x260xf32>, vector<8x260xf32>, vector<8x260xf32> -> vector<32x260xf32>
    %148 = arith.truncf %147 : vector<32x260xf32> to vector<32x260xbf16>
    %cst_116 = arith.constant dense<0.000000e+00> : vector<16x260xf32>
    %149 = tpu.matmul %146, %148, %cst_116 {dimension_numbers = #tpu.dot_dimension_numbers<[1], [0], [0], [1], [0, 0, 1, 1], [], []>} : vector<16x32xbf16>, vector<32x260xbf16>, vector<16x260xf32> -> vector<16x260xf32>
    %c2_117 = arith.constant 2 : index
    %c0_118 = arith.constant 0 : index
    %c0_119 = arith.constant 0 : index
    %150 = vector.load %arg8[%c2_117, %c0_118, %c0_119] : memref<4x16x1xf32, #tpu.memory_space<vmem>>, vector<1x16x1xf32>
    %151 = vector.shape_cast %150 : vector<1x16x1xf32> to vector<16x1xf32>
    %152 = vector.broadcast %151 : vector<16x1xf32> to vector<16x260xf32>
    %153 = arith.addf %149, %152 : vector<16x260xf32>
    %154 = vector.extract_strided_slice %153 {offsets = [0, 0], sizes = [8, 260], strides = [1, 1]} : vector<16x260xf32> to vector<8x260xf32>
    %155 = math.tanh %154 : vector<8x260xf32>
    %156 = vector.extract_strided_slice %153 {offsets = [8, 0], sizes = [8, 260], strides = [1, 1]} : vector<16x260xf32> to vector<8x260xf32>
    %157 = arith.negf %156 : vector<8x260xf32>
    %158 = math.exp %157 : vector<8x260xf32>
    %cst_120 = arith.constant 1.000000e+00 : f32
    %159 = vector.broadcast %cst_120 : f32 to vector<8x260xf32>
    %160 = arith.addf %159, %158 : vector<8x260xf32>
    %161 = arith.divf %159, %160 : vector<8x260xf32>
    %162 = arith.mulf %155, %161 : vector<8x260xf32>
    %c2_121 = arith.constant 2 : index
    %c0_122 = arith.constant 0 : index
    %c0_123 = arith.constant 0 : index
    %163 = vector.load %arg9[%c2_121, %c0_122, %c0_123] : memref<4x16x8xbf16, #tpu.memory_space<vmem>>, vector<1x16x8xbf16>
    %164 = vector.shape_cast %163 : vector<1x16x8xbf16> to vector<16x8xbf16>
    %165 = arith.truncf %162 : vector<8x260xf32> to vector<8x260xbf16>
    %cst_124 = arith.constant dense<0.000000e+00> : vector<16x260xf32>
    %166 = tpu.matmul %164, %165, %cst_124 {dimension_numbers = #tpu.dot_dimension_numbers<[1], [0], [0], [1], [0, 0, 1, 1], [], []>} : vector<16x8xbf16>, vector<8x260xbf16>, vector<16x260xf32> -> vector<16x260xf32>
    %c2_125 = arith.constant 2 : index
    %c0_126 = arith.constant 0 : index
    %c0_127 = arith.constant 0 : index
    %167 = vector.load %arg10[%c2_125, %c0_126, %c0_127] : memref<4x16x1xf32, #tpu.memory_space<vmem>>, vector<1x16x1xf32>
    %168 = vector.shape_cast %167 : vector<1x16x1xf32> to vector<16x1xf32>
    %169 = vector.broadcast %168 : vector<16x1xf32> to vector<16x260xf32>
    %170 = arith.addf %166, %169 : vector<16x260xf32>
    %c0_128 = arith.constant 0 : index
    %c2_129 = arith.constant 2 : index
    %171 = vector.load %arg17[%c0_128, %c2_129] : memref<8x264xf32, #tpu.memory_space<vmem>>, vector<8x260xf32>
    %172 = vector.extract_strided_slice %170 {offsets = [0, 0], sizes = [8, 260], strides = [1, 1]} : vector<16x260xf32> to vector<8x260xf32>
    %173 = arith.addf %172, %171 : vector<8x260xf32>
    %174 = vector.broadcast %62 : vector<1x260xf32> to vector<8x260xf32>
    %175 = arith.mulf %173, %174 : vector<8x260xf32>
    %c0_130 = arith.constant 0 : index
    %c2_131 = arith.constant 2 : index
    %176 = vector.load %arg17[%c0_130, %c2_131] : memref<8x264xf32, #tpu.memory_space<vmem>>, vector<8x260xf32>
    tpu.vector_store %arg17[%c0_130, %c2_131], %175 {strides = array<i32>} : memref<8x264xf32, #tpu.memory_space<vmem>>, vector<8x260xf32>,
    %c0_132 = arith.constant 0 : index
    %c0_133 = arith.constant 0 : index
    %177 = vector.load %arg19[%c0_132, %c0_133] : memref<8x260xf32, #tpu.memory_space<vmem>>, vector<8x260xf32>
    %178 = vector.extract_strided_slice %170 {offsets = [8, 0], sizes = [8, 260], strides = [1, 1]} : vector<16x260xf32> to vector<8x260xf32>
    %179 = arith.addf %177, %178 : vector<8x260xf32>
    %c0_134 = arith.constant 0 : index
    %c0_135 = arith.constant 0 : index
    %180 = vector.load %arg19[%c0_134, %c0_135] : memref<8x260xf32, #tpu.memory_space<vmem>>, vector<8x260xf32>
    tpu.vector_store %arg19[%c0_134, %c0_135], %179 {strides = array<i32>} : memref<8x260xf32, #tpu.memory_space<vmem>>, vector<8x260xf32>,
    %c0_136 = arith.constant 0 : index
    %c0_137 = arith.constant 0 : index
    %181 = vector.load %arg17[%c0_136, %c0_137] : memref<8x264xf32, #tpu.memory_space<vmem>>, vector<8x260xf32>
    %c0_138 = arith.constant 0 : index
    %c2_139 = arith.constant 2 : index
    %182 = vector.load %arg17[%c0_138, %c2_139] : memref<8x264xf32, #tpu.memory_space<vmem>>, vector<8x260xf32>
    %c0_140 = arith.constant 0 : index
    %c4_141 = arith.constant 4 : index
    %183 = vector.load %arg17[%c0_140, %c4_141] : memref<8x264xf32, #tpu.memory_space<vmem>>, vector<8x260xf32>
    %c0_142 = arith.constant 0 : index
    %c0_143 = arith.constant 0 : index
    %184 = vector.load %arg18[%c0_142, %c0_143] : memref<8x260xf32, #tpu.memory_space<vmem>>, vector<8x260xf32>
    %c3_144 = arith.constant 3 : index
    %c0_145 = arith.constant 0 : index
    %c0_146 = arith.constant 0 : index
    %185 = vector.load %arg7[%c3_144, %c0_145, %c0_146] : memref<4x16x32xbf16, #tpu.memory_space<vmem>>, vector<1x16x32xbf16>
    %186 = vector.shape_cast %185 : vector<1x16x32xbf16> to vector<16x32xbf16>
    %187 = tpu.concatenate %181, %182, %183, %184 in 0 : vector<8x260xf32>, vector<8x260xf32>, vector<8x260xf32>, vector<8x260xf32> -> vector<32x260xf32>
    %188 = arith.truncf %187 : vector<32x260xf32> to vector<32x260xbf16>
    %cst_147 = arith.constant dense<0.000000e+00> : vector<16x260xf32>
    %189 = tpu.matmul %186, %188, %cst_147 {dimension_numbers = #tpu.dot_dimension_numbers<[1], [0], [0], [1], [0, 0, 1, 1], [], []>} : vector<16x32xbf16>, vector<32x260xbf16>, vector<16x260xf32> -> vector<16x260xf32>
    %c3_148 = arith.constant 3 : index
    %c0_149 = arith.constant 0 : index
    %c0_150 = arith.constant 0 : index
    %190 = vector.load %arg8[%c3_148, %c0_149, %c0_150] : memref<4x16x1xf32, #tpu.memory_space<vmem>>, vector<1x16x1xf32>
    %191 = vector.shape_cast %190 : vector<1x16x1xf32> to vector<16x1xf32>
    %192 = vector.broadcast %191 : vector<16x1xf32> to vector<16x260xf32>
    %193 = arith.addf %189, %192 : vector<16x260xf32>
    %194 = vector.extract_strided_slice %193 {offsets = [0, 0], sizes = [8, 260], strides = [1, 1]} : vector<16x260xf32> to vector<8x260xf32>
    %195 = math.tanh %194 : vector<8x260xf32>
    %196 = vector.extract_strided_slice %193 {offsets = [8, 0], sizes = [8, 260], strides = [1, 1]} : vector<16x260xf32> to vector<8x260xf32>
    %197 = arith.negf %196 : vector<8x260xf32>
    %198 = math.exp %197 : vector<8x260xf32>
    %cst_151 = arith.constant 1.000000e+00 : f32
    %199 = vector.broadcast %cst_151 : f32 to vector<8x260xf32>
    %200 = arith.addf %199, %198 : vector<8x260xf32>
    %201 = arith.divf %199, %200 : vector<8x260xf32>
    %202 = arith.mulf %195, %201 : vector<8x260xf32>
    %c3_152 = arith.constant 3 : index
    %c0_153 = arith.constant 0 : index
    %c0_154 = arith.constant 0 : index
    %203 = vector.load %arg9[%c3_152, %c0_153, %c0_154] : memref<4x16x8xbf16, #tpu.memory_space<vmem>>, vector<1x16x8xbf16>
    %204 = vector.shape_cast %203 : vector<1x16x8xbf16> to vector<16x8xbf16>
    %205 = arith.truncf %202 : vector<8x260xf32> to vector<8x260xbf16>
    %cst_155 = arith.constant dense<0.000000e+00> : vector<16x260xf32>
    %206 = tpu.matmul %204, %205, %cst_155 {dimension_numbers = #tpu.dot_dimension_numbers<[1], [0], [0], [1], [0, 0, 1, 1], [], []>} : vector<16x8xbf16>, vector<8x260xbf16>, vector<16x260xf32> -> vector<16x260xf32>
    %c3_156 = arith.constant 3 : index
    %c0_157 = arith.constant 0 : index
    %c0_158 = arith.constant 0 : index
    %207 = vector.load %arg10[%c3_156, %c0_157, %c0_158] : memref<4x16x1xf32, #tpu.memory_space<vmem>>, vector<1x16x1xf32>
    %208 = vector.shape_cast %207 : vector<1x16x1xf32> to vector<16x1xf32>
    %209 = vector.broadcast %208 : vector<16x1xf32> to vector<16x260xf32>
    %210 = arith.addf %206, %209 : vector<16x260xf32>
    %c0_159 = arith.constant 0 : index
    %c2_160 = arith.constant 2 : index
    %211 = vector.load %arg17[%c0_159, %c2_160] : memref<8x264xf32, #tpu.memory_space<vmem>>, vector<8x260xf32>
    %212 = vector.extract_strided_slice %210 {offsets = [0, 0], sizes = [8, 260], strides = [1, 1]} : vector<16x260xf32> to vector<8x260xf32>
    %213 = arith.addf %212, %211 : vector<8x260xf32>
    %214 = vector.broadcast %62 : vector<1x260xf32> to vector<8x260xf32>
    %215 = arith.mulf %213, %214 : vector<8x260xf32>
    %c0_161 = arith.constant 0 : index
    %c2_162 = arith.constant 2 : index
    %216 = vector.load %arg17[%c0_161, %c2_162] : memref<8x264xf32, #tpu.memory_space<vmem>>, vector<8x260xf32>
    tpu.vector_store %arg17[%c0_161, %c2_162], %215 {strides = array<i32>} : memref<8x264xf32, #tpu.memory_space<vmem>>, vector<8x260xf32>,
    %c0_163 = arith.constant 0 : index
    %c0_164 = arith.constant 0 : index
    %217 = vector.load %arg19[%c0_163, %c0_164] : memref<8x260xf32, #tpu.memory_space<vmem>>, vector<8x260xf32>
    %218 = vector.extract_strided_slice %210 {offsets = [8, 0], sizes = [8, 260], strides = [1, 1]} : vector<16x260xf32> to vector<8x260xf32>
    %219 = arith.addf %217, %218 : vector<8x260xf32>
    %c0_165 = arith.constant 0 : index
    %c0_166 = arith.constant 0 : index
    %220 = vector.load %arg19[%c0_165, %c0_166] : memref<8x260xf32, #tpu.memory_space<vmem>>, vector<8x260xf32>
    tpu.vector_store %arg19[%c0_165, %c0_166], %219 {strides = array<i32>} : memref<8x260xf32, #tpu.memory_space<vmem>>, vector<8x260xf32>,
    %c0_167 = arith.constant 0 : index
    %c0_168 = arith.constant 0 : index
    %221 = vector.load %arg19[%c0_167, %c0_168] : memref<8x260xf32, #tpu.memory_space<vmem>>, vector<8x260xf32>
    %cst_169 = arith.constant 0.000000e+00 : f32
    %222 = vector.broadcast %cst_169 : f32 to vector<8x260xf32>
    %223 = arith.maximumf %221, %222 : vector<8x260xf32>
    %c0_170 = arith.constant 0 : index
    %c0_171 = arith.constant 0 : index
    %224 = vector.load %arg11[%c0_170, %c0_171] : memref<8x8xbf16, #tpu.memory_space<vmem>>, vector<8x8xbf16>
    %225 = arith.truncf %223 : vector<8x260xf32> to vector<8x260xbf16>
    %cst_172 = arith.constant dense<0.000000e+00> : vector<8x260xf32>
    %226 = tpu.matmul %224, %225, %cst_172 {dimension_numbers = #tpu.dot_dimension_numbers<[1], [0], [0], [1], [0, 0, 1, 1], [], []>} : vector<8x8xbf16>, vector<8x260xbf16>, vector<8x260xf32> -> vector<8x260xf32>
    %c0_173 = arith.constant 0 : index
    %c0_174 = arith.constant 0 : index
    %227 = vector.load %arg12[%c0_173, %c0_174] : memref<8x1xf32, #tpu.memory_space<vmem>>, vector<8x1xf32>
    %228 = vector.broadcast %227 : vector<8x1xf32> to vector<8x260xf32>
    %229 = arith.addf %226, %228 : vector<8x260xf32>
    %cst_175 = arith.constant 0.000000e+00 : f32
    %230 = vector.broadcast %cst_175 : f32 to vector<8x260xf32>
    %231 = arith.maximumf %229, %230 : vector<8x260xf32>
    %c0_176 = arith.constant 0 : index
    %c0_177 = arith.constant 0 : index
    %232 = vector.load %arg13[%c0_176, %c0_177] : memref<1x8xbf16, #tpu.memory_space<vmem>>, vector<1x8xbf16>
    %233 = arith.truncf %231 : vector<8x260xf32> to vector<8x260xbf16>
    %cst_178 = arith.constant dense<0.000000e+00> : vector<1x260xf32>
    %234 = tpu.matmul %232, %233, %cst_178 {dimension_numbers = #tpu.dot_dimension_numbers<[1], [0], [0], [1], [0, 0, 1, 1], [], []>} : vector<1x8xbf16>, vector<8x260xbf16>, vector<1x260xf32> -> vector<1x260xf32>
    %c0_179 = arith.constant 0 : index
    %c0_180 = arith.constant 0 : index
    %235 = vector.load %arg14[%c0_179, %c0_180] : memref<1x1xf32, #tpu.memory_space<vmem>>, vector<1x1xf32>
    %236 = vector.broadcast %235 : vector<1x1xf32> to vector<1x260xf32>
    %237 = arith.addf %234, %236 : vector<1x260xf32>
    %238 = vector.extract_strided_slice %237 {offsets = [0, 0], sizes = [1, 128], strides = [1, 1]} : vector<1x260xf32> to vector<1x128xf32>
    %c0_181 = arith.constant 0 : index
    %c0_182 = arith.constant 0 : index
    %c0_183 = arith.constant 0 : index
    %239 = vector.load %arg16[%c0_181, %c0_182, %c0_183] : memref<2x1x128xf32, #tpu.memory_space<vmem>>, vector<1x1x128xf32>
    %240 = vector.shape_cast %239 : vector<1x1x128xf32> to vector<1x128xf32>
    %241 = vector.shape_cast %238 : vector<1x128xf32> to vector<1x1x128xf32>
    tpu.vector_store %arg16[%c0_181, %c0_182, %c0_183], %241 {strides = array<i32>} : memref<2x1x128xf32, #tpu.memory_space<vmem>>, vector<1x1x128xf32>,
    %242 = vector.extract_strided_slice %237 {offsets = [0, 132], sizes = [1, 128], strides = [1, 1]} : vector<1x260xf32> to vector<1x128xf32>
    %c1_184 = arith.constant 1 : index
    %c0_185 = arith.constant 0 : index
    %c0_186 = arith.constant 0 : index
    %243 = vector.load %arg16[%c1_184, %c0_185, %c0_186] : memref<2x1x128xf32, #tpu.memory_space<vmem>>, vector<1x1x128xf32>
    %244 = vector.shape_cast %243 : vector<1x1x128xf32> to vector<1x128xf32>
    %245 = vector.shape_cast %242 : vector<1x128xf32> to vector<1x1x128xf32>
    tpu.vector_store %arg16[%c1_184, %c0_185, %c0_186], %245 {strides = array<i32>} : memref<2x1x128xf32, #tpu.memory_space<vmem>>, vector<1x1x128xf32>,
    return
  }
  func.func @transform_0(%arg0: i32) -> (i32, i32, i32) {
    %c0_i32 = arith.constant 0 : i32
    %c0_i32_0 = arith.constant 0 : i32
    %c0_i32_1 = arith.constant 0 : i32
    return %arg0, %c0_i32, %c0_i32_0 : i32, i32, i32
  }
  func.func @transform_1(%arg0: i32) -> (i32, i32, i32) {
    %c0_i32 = arith.constant 0 : i32
    %c0_i32_0 = arith.constant 0 : i32
    %c0_i32_1 = arith.constant 0 : i32
    return %arg0, %c0_i32, %c0_i32_0 : i32, i32, i32
  }
  func.func @transform_2(%arg0: i32) -> (i32, i32) {
    %c0_i32 = arith.constant 0 : i32
    %c0_i32_0 = arith.constant 0 : i32
    %c0_i32_1 = arith.constant 0 : i32
    return %c0_i32, %c0_i32_0 : i32, i32
  }
  func.func @transform_3(%arg0: i32) -> (i32, i32) {
    %c0_i32 = arith.constant 0 : i32
    %c0_i32_0 = arith.constant 0 : i32
    %c0_i32_1 = arith.constant 0 : i32
    return %c0_i32, %c0_i32_0 : i32, i32
  }
  func.func @transform_4(%arg0: i32) -> (i32, i32) {
    %c0_i32 = arith.constant 0 : i32
    %c0_i32_0 = arith.constant 0 : i32
    %c0_i32_1 = arith.constant 0 : i32
    return %c0_i32, %c0_i32_0 : i32, i32
  }
  func.func @transform_5(%arg0: i32) -> (i32, i32) {
    %c0_i32 = arith.constant 0 : i32
    %c0_i32_0 = arith.constant 0 : i32
    %c0_i32_1 = arith.constant 0 : i32
    return %c0_i32, %c0_i32_0 : i32, i32
  }
  func.func @transform_6(%arg0: i32) -> (i32, i32, i32) {
    %c0_i32 = arith.constant 0 : i32
    %c0_i32_0 = arith.constant 0 : i32
    %c0_i32_1 = arith.constant 0 : i32
    %c0_i32_2 = arith.constant 0 : i32
    return %c0_i32, %c0_i32_0, %c0_i32_1 : i32, i32, i32
  }
  func.func @transform_7(%arg0: i32) -> (i32, i32, i32) {
    %c0_i32 = arith.constant 0 : i32
    %c0_i32_0 = arith.constant 0 : i32
    %c0_i32_1 = arith.constant 0 : i32
    %c0_i32_2 = arith.constant 0 : i32
    return %c0_i32, %c0_i32_0, %c0_i32_1 : i32, i32, i32
  }
  func.func @transform_8(%arg0: i32) -> (i32, i32, i32) {
    %c0_i32 = arith.constant 0 : i32
    %c0_i32_0 = arith.constant 0 : i32
    %c0_i32_1 = arith.constant 0 : i32
    %c0_i32_2 = arith.constant 0 : i32
    return %c0_i32, %c0_i32_0, %c0_i32_1 : i32, i32, i32
  }
  func.func @transform_9(%arg0: i32) -> (i32, i32, i32) {
    %c0_i32 = arith.constant 0 : i32
    %c0_i32_0 = arith.constant 0 : i32
    %c0_i32_1 = arith.constant 0 : i32
    %c0_i32_2 = arith.constant 0 : i32
    return %c0_i32, %c0_i32_0, %c0_i32_1 : i32, i32, i32
  }
  func.func @transform_10(%arg0: i32) -> (i32, i32) {
    %c0_i32 = arith.constant 0 : i32
    %c0_i32_0 = arith.constant 0 : i32
    %c0_i32_1 = arith.constant 0 : i32
    return %c0_i32, %c0_i32_0 : i32, i32
  }
  func.func @transform_11(%arg0: i32) -> (i32, i32) {
    %c0_i32 = arith.constant 0 : i32
    %c0_i32_0 = arith.constant 0 : i32
    %c0_i32_1 = arith.constant 0 : i32
    return %c0_i32, %c0_i32_0 : i32, i32
  }
  func.func @transform_12(%arg0: i32) -> (i32, i32) {
    %c0_i32 = arith.constant 0 : i32
    %c0_i32_0 = arith.constant 0 : i32
    %c0_i32_1 = arith.constant 0 : i32
    return %c0_i32, %c0_i32_0 : i32, i32
  }
  func.func @transform_13(%arg0: i32) -> (i32, i32) {
    %c0_i32 = arith.constant 0 : i32
    %c0_i32_0 = arith.constant 0 : i32
    %c0_i32_1 = arith.constant 0 : i32
    return %c0_i32, %c0_i32_0 : i32, i32
  }
  func.func @transform_14(%arg0: i32) -> (i32, i32) {
    %c0_i32 = arith.constant 0 : i32
    %c0_i32_0 = arith.constant 0 : i32
    %c0_i32_1 = arith.constant 0 : i32
    return %c0_i32, %c0_i32_0 : i32, i32
  }
  func.func @transform_15(%arg0: i32) -> (i32, i32, i32) {
    %c0_i32 = arith.constant 0 : i32
    %c0_i32_0 = arith.constant 0 : i32
    %c0_i32_1 = arith.constant 0 : i32
    return %arg0, %c0_i32, %c0_i32_0 : i32, i32, i32
  }
}

</mosaic_0001>

<bundles_post_ra>
// kernel: tpu_custom_call.1
= control target key start
LH: loop header
LB: loop body
LE: loop exit
PB: predicated region body
PF: predicated region fallthrough
CT: control target
= control target key end

     0   :  { %s3628_s0 = inlined_call_operand.vmem [shape: f32[4,1,128], index: 0, kind: input, shape index: {}]   ;;  %s3629_s1 = inlined_call_operand.vmem [shape: f32[4,8,36], index: 1, kind: input, shape index: {}]   ;;  %s3630_s2 = inlined_call_operand.vmem [shape: bf16[8,40], index: 2, kind: input, shape index: {}]   ;;  %s3631_s3 = inlined_call_operand.vmem [shape: bf16[32,128], index: 3, kind: input, shape index: {}]   ;;  %s3632_s4 = inlined_call_operand.vmem [shape: f32[8,1], index: 4, kind: input, shape index: {}]   ;;  %s3633_s5 = inlined_call_operand.vmem [shape: f32[8,1], index: 5, kind: input, shape index: {}]   ;;  %s3634_s6 = inlined_call_operand.vmem [shape: bf16[4,16,32], index: 6, kind: input, shape index: {}]   ;;  %s3635_s7 = inlined_call_operand.vmem [shape: f32[4,16,1], index: 7, kind: input, shape index: {}]   ;;  %s3636_s8 = inlined_call_operand.vmem [shape: bf16[4,16,8], index: 8, kind: input, shape index: {}]   ;;  %s3637_s9 = inlined_call_operand.vmem [shape: f32[4,16,1], index: 9, kind: input, shape index: {}]   ;;  %s3638_s10 = inlined_call_operand.vmem [shape: bf16[8,8], index: 10, kind: input, shape index: {}]   ;;  %s3639_s11 = inlined_call_operand.vmem [shape: f32[8,1], index: 11, kind: input, shape index: {}]   ;;  %s3640_s12 = inlined_call_operand.vmem [shape: bf16[1,8], index: 12, kind: input, shape index: {}]   ;;  %s3641_s13 = inlined_call_operand.<no memory space> [shape: f32[1,1], index: 13, kind: input, shape index: {}]   ;;  %s3642_s14 = inlined_call_operand.vmem [shape: f32[1,260], index: 14, kind: input, shape index: {}]   ;;  %s3643_s15 = inlined_call_operand.hbm [shape: f32[4,1,128], index: 15, kind: output, shape index: {}]  }
   0x1   :  { %3654 = sst [smem:[#allocation9_spill]] %s3628_s0  ;;  %v20_v0 = vstv %s3641_s13 }
   0x2   :  { %3655 = sst [smem:[#allocation10_spill]] %s3629_s1  ;;  %21 = vst [vmem:[#allocation5] sm:$0x1] %v20_v0 }
   0x3   :  { %3656 = sst [smem:[#allocation11_spill]] %s3630_s2 }
   0x4   :  { %3657 = sst [smem:[#allocation12_spill]] %s3631_s3 }
   0x5   :  { %3658 = sst [smem:[#allocation13_spill]] %s3632_s4 }
   0x6   :  { %3659 = sst [smem:[#allocation14_spill]] %s3633_s5 }
   0x7   :  { %22 = vsyncpa [#allocation7], 0 }
   0x8   :  { %24 = vsyncpa [#allocation7 + $0x1], 0  ;;  %s3052_s20 = smov 0   ;;  %s3054_s21 = smov 0  }
   0x9   :  { %s3056_s22 = smov 0   ;;  %s3058_s23 = smov 0  }
   0xa LB: > { %s3073_s13 = sadd.s32 4294967295, %s2954_s23   ;;  %s2482_s24 = sadd.s32 4294967294, %s2954_s23   ;;  %s2954_s23 = sphi %s3058_s23, %s3676_s23   ;;  %s2950_s22 = sphi %s3056_s22, %s3675_s22   ;;  %s2946_s21 = sphi %s3054_s21, %s3674_s21   ;;  %s2942_s20 = sphi %s3052_s20, %s3673_s20  }
   0xb   : > { %s3077_s25 = sadd.s32 1, %s2954_s23   ;;  %s362_s26 = sadd.s32 1, %s2950_s22 }
   0xc   : > { %s359_s27 = ssub.s32 %s2954_s23, %s3077_s25  ;;  %p372_p0 = scmp.ne.s32.totalorder %s2950_s22, %s2946_s21 }
   0xd   : > { %p360_p1 = scmp.eq.s32.totalorder %s359_s27, 0  ;;  %p373_p2 = scmp.eq.s32.totalorder %s3073_s13, 1 }
   0xe   : > { %p378_p3 = scmp.ne.s32.totalorder %s2946_s21, %s2942_s20  ;;  %p379_p4 = scmp.eq.s32.totalorder %s2482_s24, 1 }
   0xf   : > { %s3088_s28 = scalar_select %p360_p1, %s2950_s22, %s362_s26  }
  0x10   : > { %p3090_p5 = por %p373_p2, %p372_p0  ;;  %p3094_p6 = por %p379_p4, %p378_p3 }
  0x11   : > { %p2485_p7 = scmp.ge.s32.totalorder %s2954_s23, 1  ;;  %p453_p8 = scmp.lt.s32.totalorder %s2954_s23, 3 }
  0x13   : > { %p454_p9 = pnand %p2485_p7, %p453_p8 }
  0x14   : > { %s2487_s16 = sshll.u32 (!%p454_p9), %s3073_s13, 1  ;;  %v2956_v1 = vmov (!%p454_p9), 0.0   ;;  %s3662_s1 = sld [smem:[#allocation10_spill]] (!%p454_p9)  ;;  %vm2959_vm0 = vmmov (!%p454_p9), 0   ;;  %v2960_v5 = vmov (!%p454_p9), 0   ;;  %vm540_vm1 = vcmask (!%p454_p9), 1043456  }
  0x15   : > { %457 = sbr.rel (%p454_p9) target bundleno = 4307 (0x10d3), region = 80  ;;  %p506_p10 = scmp.lt.s32.totalorder (!%p454_p9), %s2487_s16, 3  ;;  %2611 = vmatprep.subr.bf16.mxu0 (!%p454_p9), %v2956_v1  ;;  %708 = vst [vmem:[#allocation3 + $0x8] sm:$0xff] (!%p454_p9), %v2956_v1  ;;  %2621 = vmatprep.subr.bf16.mxu1 (!%p454_p9), %v2956_v1  ;;  %vm536_vm2 = vcmask (!%p454_p9), 326656   ;;  %vm719_vm3 = vcmask (!%p454_p9), 15360   ;;  %vm721_vm4 = vcmask (!%p454_p9), 31760  }
  0x16   : > { %s3644_s26 = smov (!%p454_p9), 127   ;;  %s2958_s27 = smov (!%p454_p9), 125   ;;  %2617 = vmatprep.mubr.msk.bf16.mxu0 (!%p454_p9), %vm2959_vm0, %v2956_v1  ;;  %2627 = vmatprep.mubr.msk.bf16.mxu1 (!%p454_p9), %vm2959_vm0, %v2956_v1  ;;  %720 = vst.msk [vmem:[#allocation2] sm:$0xff] (!%p454_p9), %vm719_vm3, %v2956_v1  ;;  %vm753_vm5 = vcmask (!%p454_p9), 64560   ;;  %vm748_vm6 = vcmask (!%p454_p9), 1047568   ;;  %vm751_vm7 = vcmask (!%p454_p9), 48160  }
  0x17   : > { %2779 = vset.pattern.permute.xlu1 (!%p454_p9), %v2960_v5  ;;  %2778 = vset.pattern.permute.xlu0 (!%p454_p9), %v2960_v5  ;;  %s3646_s18 = smov (!%p454_p9), 124   ;;  %s3663_s5 = sld [smem:[#allocation14_spill]] (!%p454_p9)  ;;  %722 = vst.msk [vmem:[#allocation2 + $0x8] sm:$0xff] (!%p454_p9), %vm721_vm4, %v2956_v1  ;;  %vm781_vm8 = vcmask (!%p454_p9), 1047600   ;;  %vm783_vm9 = vcmask (!%p454_p9), 48128   ;;  %vm662_vm10 = vcmask (!%p454_p9), 261120  }
  0x18   : > { %s3664_s4 = sld [smem:[#allocation13_spill]] (!%p454_p9)  ;;  %s3665_s2 = sld [smem:[#allocation11_spill]] (!%p454_p9)  ;;  %754 = vst.msk [vmem:[#allocation2 + $0x10] sm:$0xff] (!%p454_p9), %vm753_vm5, %v2956_v1  ;;  %vm709_vm11 = vcmask (!%p454_p9), 31744   ;;  %vm716_vm12 = vcmask (!%p454_p9), 1047584   ;;  %vm804_vm13 = vcmask (!%p454_p9), 1039360  }
  0x19   : > { %s3666_s3 = sld [smem:[#allocation12_spill]] (!%p454_p9)  ;;  %s3667_s0 = sld [smem:[#allocation9_spill]] (!%p454_p9)  ;;  %710 = vst.msk [vmem:[#allocation3 + $0x10] sm:$0xff] (!%p454_p9), %vm709_vm11, %v2956_v1  ;;  %vm816_vm14 = vcmask (!%p454_p9), 1031168   ;;  %vm831_vm15 = vcmask (!%p454_p9), 7168   ;;  %vm1190_vm4 = vcmask (!%p454_p9), 1014784  }
  0x1a   : > { %s2965_s19 = smov (!%p454_p9), 4  }
  0x1c   : > { %s3678_s16 = smov (!%p506_p10, %s2487_s16), 3 }
  0x1d   : > { %s2489_s17 = sshll.u32 %s3678_s16, 3  ;;  %v737_v6 = vld [vmem:[%s3663_s5] sm:$0xff] }
  0x1e   : > { %s514_s24 = scalar_lea.vmem %s3662_s1, %s2489_s17  ;;  %s3650_s17 = smov 126   ;;  %v723_v7 = vld [vmem:[%s3664_s4] sm:$0xff] }
  0x1f   : > { %v518_v2 = vld [vmem:[%s514_s24] sm:$0xff]  ;;  %v2491_v3 = vld [vmem:[%s514_s24 + $0x8] sm:$0xff]  ;;  %s3648_s24 = smov 1  }
  0x20   : > { %v2758_v4 = vpack.i.bf16 %v2491_v3, %v518_v2  ;;  %v532_v28 = vld [vmem:[%s3665_s2] sm:$0xf]  ;;  %v2811_v30 = vld [vmem:[%s3666_s3 + $0x8] sm:$0xff]  }
  0x21   : > { %v2810_v29 = vld [vmem:[%s3666_s3] sm:$0xff]  }
  0x22   : > { %2759 = vrot.lane.b32.xlu0 %v2758_v4, %s3644_s26  ;;  %2769 = vrot.lane.b32.xlu1 %v2758_v4, %s2958_s27  ;;  %s3652_s26 = smov 2   ;;  %s3669_s27 = smov 2  }
  0x26   : > { %2764 = vrot.lane.b32.xlu0 %v2758_v4, %s3650_s17  ;;  %2774 = vrot.lane.b32.xlu1 %v2758_v4, %s3646_s18  ;;  %s508_s18 = scalar_lea.vmem %s3667_s0, %s3678_s16  ;;  %s2964_s16 = smov 6  }
  0x27   : > { %v2496_v33 = vld [vmem:[%s508_s18] ss:$0 sm:$0xff]  ;;  %v2498_v35 = vld [vmem:[%s508_s18 + $0x1] ss:$0 sm:$0xff]  ;;  %s3668_s18 = smov 127   ;;  %s2575_s0 = sshll.u32 %s3073_s13, 5 }
  0x28   : > { %s3577_s1 = scalar_lea.hbm %s3643_s15, %s2575_s0  ;;  %s2967_s13 = smov [#allocation6]  }
  0x2a   : > { %740 = vperm.xlu1 %2779, %v737_v6   ;;  %727 = vperm.xlu0 %2778, %v723_v7  }
  0x2e   : > { %760 = vperm.xlu1 %2779, %v723_v7   ;;  %773 = vperm.xlu0 %2778, %v737_v6  }
  0x94   : > { %v2760_v8 = vpop.permute.xlu0 %2759  ;;  %v2770_v9 = vpop.permute.xlu1 %2769 }
  0x95   : > { %v2762_v10 = vunpack.i.h.bf16 %v2760_v8  ;;  %v2761_v11 = vunpack.i.l.bf16 %v2760_v8  ;;  %v2772_v12 = vunpack.i.h.bf16 %v2770_v9  ;;  %v2771_v13 = vunpack.i.l.bf16 %v2770_v9 }
  0x97   : > { %v533_v14 = vpack.c.bf16 %v2761_v11, %v518_v2  ;;  %v599_v15 = vpack.c.bf16 %v2762_v10, %v2491_v3 }
  0x98   : > { %v2765_v16 = vpop.permute.xlu0 %2764  ;;  %v2775_v17 = vpop.permute.xlu1 %2774 }
  0x99   : > { %v2767_v18 = vunpack.i.h.bf16 %v2765_v16  ;;  %v2766_v19 = vunpack.i.l.bf16 %v2765_v16  ;;  %2612 = vmatpush3.bf16.msra.mxu0 %v533_v14  ;;  %2622 = vmatpush3.bf16.msra.mxu1 %v599_v15  ;;  %v2777_v20 = vunpack.i.h.bf16 %v2775_v17  ;;  %v2776_v21 = vunpack.i.l.bf16 %v2775_v17 }
  0x9a   : > { %2613 = vmatprep.subr.bf16.mxu0 %v2956_v1  ;;  %2623 = vmatprep.subr.bf16.mxu1 %v2956_v1 }
  0x9b   : > { %v600_v22 = vpack.c.bf16 %v2772_v12, %v2767_v18  ;;  %v534_v23 = vpack.c.bf16 %v2771_v13, %v2766_v19  ;;  %v601_v24 = vpack.c.bf16 %v2777_v20, %v2777_v20  ;;  %v535_v25 = vpack.c.bf16 %v2776_v21, %v2776_v21 }
  0x9d   : > { %2614 = vmatpush3.bf16.msra.mxu0 %v534_v23  ;;  %2624 = vmatpush3.bf16.msra.mxu1 %v600_v22  ;;  %v542_v26 = vsel %vm540_vm1, %v535_v25, 0  ;;  %v603_v27 = vsel %vm540_vm1, %v601_v24, 0  ;;  %v844_v25 = vld [vmem:[%s3635_s7 + $0x8] sm:$0xff] }
  0x9e   : > { %2615 = vmatprep.subr.bf16.mxu0 %v2956_v1  ;;  %2625 = vmatprep.subr.bf16.mxu1 %v2956_v1 }
  0xa1   : > { %2616 = vmatpush3.bf16.msra.mxu0 %v542_v26  ;;  %2626 = vmatpush3.bf16.msra.mxu1 %v603_v27 }
  0xa2   : > { %2631 = vmatprep.subr.bf16.mxu0 %v2956_v1 }
  0xa4   : > { %2618 = vmatmul.mubr.msk.bf16.vlgmr.msra.gmra.mrb[0].mxu0 %vm536_vm2, %v532_v28  ;;  %2628 = vmatmul.mubr.msk.bf16.vlgmr.msra.gmra.mrb[0].mxu1 %vm536_vm2, %v532_v28  ;;  %vm1022_vm2 = vcmask 64512  }
  0xa5   : > { %2632 = vmatpush3.bf16.msra.mxu0 %v2810_v29  ;;  %2635 = vmatprep.mubr.msk.bf16.mxu0 %vm2959_vm0, %v2956_v1 }
  0xa6   : > { %2633 = vmatprep.subr.bf16.mxu0 %v2956_v1  ;;  %924 = vmatprep.mubr.bf16.mxu1 %v2960_v5 }
  0xa9   : > { %2634 = vmatpush3.bf16.msra.mxu0 %v2811_v30  ;;  %v741_v31 = vpop.permute.xlu1 %740  ;;  %v728_v32 = vpop.permute.xlu0 %727 }
  0xaa   : > { %2639 = vmatprep.subr.bf16.mxu0 %v2956_v1  ;;  %v736_v34 = vmul.f32 %v2496_v33, %v728_v32  ;;  %v1005_v32 = vld [vmem:[%s3637_s9] sm:$0xff] }
  0xac   : > { %v743_v36 = vadd.f32 %v741_v31, %v736_v34  ;;  %v843_v31 = vld [vmem:[%s3635_s7] sm:$0xff] }
  0xad   : > { %v761_v37 = vpop.permute.xlu1 %760  ;;  %v774_v38 = vpop.permute.xlu0 %773 }
  0xae   : > { %v769_v39 = vmul.f32 %v2498_v35, %v761_v37  ;;  %745 = vrot.lane.b32.xlu1 %v743_v36, %s3652_s26  ;;  %v2812_v35 = vld [vmem:[%s3634_s6] sm:$0xff]   ;;  %s2896_s26 = sshll.u32 %s2967_s13, 4  ;;  %s2897_s26 = int_to_ptr.vmem [resolvable:$false] %s2896_s26 }
  0xb0   : > { %v776_v40 = vadd.f32 %v774_v38, %v769_v39 }
  0xb2   : > { %778 = vrot.lane.b32.xlu0 %v776_v40, %s2964_s16  ;;  %s3670_s16 = smov 126  }
 0x120   : > { %v746_v41 = vpop.permute.xlu1 %745 }
 0x121   : > { %749 = vst.msk [vmem:[#allocation2] sm:$0xff] %vm748_vm6, %v746_v41 }
 0x122   : > { %750 = vst.msk [vmem:[#allocation2 + $0x8] sm:$0xff] %vm719_vm3, %v746_v41 }
 0x123   : > { %752 = vst.msk [vmem:[#allocation2 + $0x8] sm:$0xff] %vm751_vm7, %v2956_v1 }
 0x124   : > { %v779_v42 = vpop.permute.xlu0 %778 }
 0x125   : > { %782 = vst.msk [vmem:[#allocation2 + $0x8] sm:$0xff] %vm781_vm8, %v779_v42 }
 0x126   : > { %784 = vst.msk [vmem:[#allocation2 + $0x10] sm:$0xff] %vm783_vm9, %v779_v42 }
 0x128   : > { %v787_v59 = vld [vmem:[#allocation2] sm:$0xff] }
 0x12c   : > { %v788_v52 = vld [vmem:[#allocation2 + $0x8] sm:$0xff] }
 0x12d   : > { %v789_v53 = vld [vmem:[#allocation2 + $0x10] sm:$0xff] }
 0x12e   : > { %v2780_v54 = vpack.i.bf16 %v789_v53, %v788_v52 }
 0x130   : > { %2781 = vrot.lane.b32.xlu0 %v2780_v54, %s3668_s18 }
 0x134   : > { %812 = vrot.lane.b32.xlu0 %v788_v52, %s3650_s17 }
 0x177   : > { %v578_v43 = vpop.f32.mrb[0].mxu0  ;;  %v639_v44 = vpop.f32.mrb[0].mxu1 }
 0x178   : > { %v649_v45 = vpack.c.bf16 %v639_v44, %v578_v43  ;;  %v2619_v46 = vpop.f32.mrb[1].mxu0  ;;  %v2629_v47 = vpop.f32.mrb[1].mxu1 }
 0x179   : > { %v581_v48 = vpop.f32.mrb[2].mxu0  ;;  %v642_v49 = vpop.f32.mrb[2].mxu1 }
 0x17a   : > { %v2620_v50 = vpop.f32.mrb[3].mxu0  ;;  %v2630_v51 = vpop.f32.mrb[3].mxu1  ;;  %2636 = vmatmul.mubr.msk.bf16.vlgmr.msra.gmra.mrb[4].mxu0 %vm662_vm10, %v649_v45 }
 0x17b   : > { %2643 = vmatprep.mubr.msk.bf16.mxu0 %vm2959_vm0, %v2956_v1 }
 0x1a2   : > { %v2782_v61 = vpop.permute.xlu0 %2781 }
 0x1a3   : > { %v2784_v62 = vunpack.i.h.bf16 %v2782_v61  ;;  %v2783_v63 = vunpack.i.l.bf16 %v2782_v61 }
 0x1a5   : > { %v806_v3 = vsel %vm804_vm13, %v2783_v63, %v2784_v62  ;;  %v839_v10 = vpack.c.bf16 %v2784_v62, %v789_v53 }
 0x1a6   : > { %v838_v7 = vpack.c.bf16 %v806_v3, %v788_v52  ;;  %v813_v12 = vpop.permute.xlu0 %812 }
 0x24d   : > { %v3166_v55 = vpop.f32.mrb[4].mxu0 }
 0x24e   : > { %v2637_v56 = vpop.f32.mrb[5].mxu0 }
 0x24f   : > { %v703_v57 = vpop.f32.mrb[6].mxu0 }
 0x250   : > { %v2638_v58 = vpop.f32.mrb[7].mxu0  ;;  %713 = vrot.lane.b32.xlu1 %v703_v57, %s2965_s19  ;;  %s502_s19 = sand.u32 1, %s2946_s21  }
 0x251   : > { %s2486_s3 = sshll.u32 %s502_s19, 1  ;;  %s3582_s2 = scalar_lea.sflag [#allocation7], %s502_s19 }
 0x252   : > { %s504_s4 = scalar_lea.vmem [#allocation6], %s2486_s3 }
 0x253   : > { %s2411_s5 = sshll.u32 %s504_s4, 4  ;;  %s3572_s5 = int_to_ptr.vmem [resolvable:$true] %s2411_s5 }
 0x254   : > { %798 = vrot.lane.b32.xlu1 %v787_v59, %s3668_s18  ;;  %p2899_p0 = scmp.lt.s32.totalorder %s3572_s5, %s2897_s26 }
 0x258   : > { %814 = vrot.lane.b32.xlu1 %v789_v53, %s3650_s17 }
 0x2c2   : > { %v714_v60 = vpop.permute.xlu1 %713 }
 0x2c3   : > { %717 = vst.msk [vmem:[#allocation3 + $0x8] sm:$0xff] %vm716_vm12, %v714_v60 }
 0x2c4   : > { %718 = vst.msk [vmem:[#allocation3 + $0x10] sm:$0xff] %vm709_vm11, %v714_v60 }
 0x2c6   : > { %v799_v4 = vpop.permute.xlu1 %798 }
 0x2c7   : > { %v805_v8 = vsel %vm804_vm13, %v799_v4, %v2783_v63 }
 0x2c8   : > { %v837_v9 = vpack.c.bf16 %v805_v8, %v787_v59 }
 0x2ca   : > { %v3173_v2 = vld [vmem:[#allocation3 + $0x8] sm:$0xff]  ;;  %v3189_v11 = vpop.permute.xlu1 %814 }
 0x2cb   : > { %v3171_v0 = vld [vmem:[#allocation3 + $0x10] sm:$0xff]  ;;  %v3180_v6 = vpack.i.bf16 %v3173_v2, %v3166_v55  ;;  %v3193_v18 = vsel %vm816_vm14, %v813_v12, %v3189_v11 }
 0x2cc   : > { %829 = vrot.lane.b32.xlu1 %v3171_v0, %s3648_s24 }
 0x2cd   : > { %2786 = vrot.lane.b32.xlu0 %v3180_v6, %s3648_s24  ;;  %s3672_s24 = smov 1  }
 0x2d0   : > { %868 = vrot.lane.b32.xlu1 %v838_v7, %s3668_s18 }
 0x2d1   : > { %810 = vrot.lane.b32.xlu0 %v787_v59, %s3650_s17  ;;  %s3671_s17 = smov 124  }
 0x2d4   : > { %866 = vrot.lane.b32.xlu1 %v837_v9, %s3668_s18 }
 0x2d5   : > { %870 = vrot.lane.b32.xlu0 %v839_v10, %s3668_s18 }
 0x33e   : > { %v830_v13 = vpop.permute.xlu1 %829 }
 0x33f   : > { %v2787_v14 = vpop.permute.xlu0 %2786 }
 0x340   : > { %v2789_v15 = vunpack.i.h.bf16 %v2787_v14  ;;  %v2788_v16 = vunpack.i.l.bf16 %v2787_v14 }
 0x342   : > { %v869_v17 = vpop.permute.xlu1 %868  ;;  %v832_v19 = vsel %vm831_vm15, %v2788_v16, %v2789_v15  ;;  %v833_v20 = vsel %vm831_vm15, %v2789_v15, %v830_v13  ;;  %v2813_v15 = vld [vmem:[%s3636_s8] sm:$0xff]  }
 0x343   : > { %v811_v21 = vpop.permute.xlu0 %810  ;;  %v841_v22 = vpack.c.bf16 %v832_v19, %v3193_v18  ;;  %v842_v23 = vpack.c.bf16 %v833_v20, %v3189_v11 }
 0x344   : > { %v3200_v24 = vsel %vm816_vm14, %v811_v21, %v813_v12 }
 0x345   : > { %874 = vrot.lane.b32.xlu0 %v841_v22, %s3668_s18  ;;  %876 = vrot.lane.b32.xlu1 %v842_v23, %s3668_s18  ;;  %v840_v26 = vpack.c.bf16 %v2788_v16, %v3200_v24  ;;  %v1123_v23 = vlaneseq }
 0x346   : > { %v867_v27 = vpop.permute.xlu1 %866 }
 0x347   : > { %v871_v28 = vpop.permute.xlu0 %870  ;;  %v879_v30 = vsel %vm804_vm13, %v867_v27, %v869_v17  ;;  %v3241_v27 = vshrl.u32 %v1123_v23, 7 }
 0x348   : > { %2640 = vmatpush3.bf16.msra.mxu0 %v871_v28  ;;  %v880_v29 = vsel %vm804_vm13, %v869_v17, %v871_v28 }
 0x349   : > { %872 = vrot.lane.b32.xlu0 %v840_v26, %s3668_s18  ;;  %852 = vperm.xlu1 %2779, %v844_v25  }
 0x34a   : > { %892 = vmatprep.subr.bf16.mxu1 %v880_v29  ;;  %2641 = vmatprep.subr.bf16.mxu0 %v2956_v1  ;;  %v785_v29 = vld [vmem:[%s3642_s14] sm:$0x7] }
 0x34b   : > { %893 = vmatpush1.bf16.msra.mxu1 %v879_v30 }
 0x34d   : > { %847 = vperm.xlu0 %2778, %v843_v31   ;;  %1009 = vperm.xlu1 %2779, %v1005_v32   ;;  %v1125_v31 = vsub.s32 0, %v3241_v27  ;;  %v1129_v32 = vsub.s32 1, %v3241_v27 }
 0x3b7   : > { %v875_v33 = vpop.permute.xlu0 %874  ;;  %v877_v34 = vpop.permute.xlu1 %876 }
 0x3b8   : > { %2642 = vmatpush3.bf16.msra.mxu0 %v877_v34  ;;  %v882_v36 = vsel %vm804_vm13, %v875_v33, %v877_v34 }
 0x3b9   : > { %894 = vmatprep.subr.bf16.mxu1 %v882_v36  ;;  %2647 = vmatprep.subr.bf16.mxu0 %v2956_v1 }
 0x3bb   : > { %v873_v37 = vpop.permute.xlu0 %872  ;;  %2644 = vmatmul.mubr.msk.bf16.vlgmr.msra.gmra.mrb[8].mxu0 %vm662_vm10, %v2812_v35 }
 0x3bc   : > { %v881_v38 = vsel %vm804_vm13, %v873_v37, %v875_v33  ;;  %2649 = vmatprep.mubr.msk.bf16.mxu0 %vm2959_vm0, %v2956_v1  ;;  %v786_v33 = vmul.f32 0.70710677, %v785_v29 }
 0x3bd   : > { %895 = vmatpush1.bf16.msra.mxu1 %v881_v38 }
 0x3c0   : > { %2500 = vmatmul.mubr.msk.bf16.vlgmr.msra.gmra.mrb[4].mxu1 %vm662_vm10, %v2812_v35 }
 0x3c1   : > { %1067 = vmatprep.mubr.bf16.mxu1 %v2960_v5 }
 0x3c8   : > { %v853_v41 = vpop.permute.xlu1 %852 }
 0x3cc   : > { %v848_v54 = vpop.permute.xlu0 %847  ;;  %v1010_v34 = vpop.permute.xlu1 %1009 }
 0x48e   : > { %v969_v39 = vpop.f32.mrb[8].mxu0 }
 0x48f   : > { %v2645_v40 = vpop.f32.mrb[9].mxu0  ;;  %v970_v56 = vadd.f32 %v969_v39, %v848_v54  ;;  %v3252_v39 = vrot.slane %v786_v33, %v1125_v31 }
 0x490   : > { %v972_v42 = vpop.f32.mrb[10].mxu0  ;;  %v1133_v40 = vsub.s32 2, %v3241_v27 }
 0x491   : > { %v973_v43 = vadd.f32 %v972_v42, %v853_v41  ;;  %v2646_v44 = vpop.f32.mrb[11].mxu0 }
 0x493   : > { %v2504_v45 = vmul.f32 -1.442695, %v973_v43  ;;  %v926_v46 = vpop.f32.mrb[4].mxu1  ;;  %v3257_v43 = vrot.slane %v786_v33, %v1129_v32 }
 0x494   : > { %v928_v47 = vpop.f32.mrb[5].mxu1  ;;  %v927_v59 = vadd.f32 %v926_v46, %v848_v54 }
 0x495   : > { %2820 = vpow2.f32 %v2504_v45  ;;  %v930_v48 = vpop.f32.mrb[6].mxu1  ;;  %v929_v60 = vadd.f32 %v928_v47, %v848_v54 }
 0x496   : > { %v931_v49 = vadd.f32 %v930_v48, %v853_v41  ;;  %v932_v50 = vpop.f32.mrb[7].mxu1 }
 0x497   : > { %v933_v51 = vadd.f32 %v932_v50, %v853_v41 }
 0x498   : > { %v2502_v52 = vmul.f32 -1.442695, %v931_v49  ;;  %v3265_v49 = vrot.slane %v786_v33, %v1133_v40 }
 0x499   : > { %v2503_v53 = vmul.f32 -1.442695, %v933_v51 }
 0x49a   : > { %2822 = vpow2.f32 %v2502_v52 }
 0x49b   : > { %2824 = vpow2.f32 %v2503_v53 }
 0x49c   : > { %2826 = vtanh.f32 %v970_v56 }
 0x49f   : > { %v2821_v57 = vpop.eup %2820 }
 0x4a0   : > { %v990_v58 = vadd.f32 1.0, %v2821_v57  ;;  %v2511_v57 = vld [vmem:[%s3635_s7 + $0x10] sm:$0xff] }
 0x4a2   : > { %2828 = vrcp.f32 %v990_v58 }
 0x4a3   : > { %2830 = vtanh.f32 %v927_v59  ;;  %v2512_v59 = vld [vmem:[%s3635_s7 + $0x18] sm:$0xff] }
 0x4a4   : > { %v2823_v61 = vpop.eup %2822  ;;  %2832 = vtanh.f32 %v929_v60  ;;  %v2521_v60 = vld [vmem:[%s3637_s9 + $0x10] sm:$0xff] }
 0x4a5   : > { %v2825_v62 = vpop.eup %2824  ;;  %v988_v63 = vadd.f32 1.0, %v2823_v61 }
 0x4a6   : > { %v989_v3 = vadd.f32 1.0, %v2825_v62  ;;  %v2827_v4 = vpop.eup %2826 }
 0x4a7   : > { %2834 = vrcp.f32 %v988_v63 }
 0x4a8   : > { %2836 = vrcp.f32 %v989_v3 }
 0x4ac   : > { %v2829_v7 = vpop.eup %2828 }
 0x4ad   : > { %v999_v8 = vmul.f32 %v2829_v7, %v2827_v4  ;;  %v2831_v9 = vpop.eup %2830 }
 0x4ae   : > { %v2833_v12 = vpop.eup %2832 }
 0x4af   : > { %v1004_v10 = vpack.c.bf16 %v999_v8, %v999_v8 }
 0x4b1   : > { %v2835_v13 = vpop.eup %2834  ;;  %v1033_v14 = vsel %vm540_vm1, %v1004_v10, 0 }
 0x4b2   : > { %v2837_v16 = vpop.eup %2836  ;;  %2648 = vmatpush3.bf16.msra.mxu0 %v1033_v14  ;;  %v997_v17 = vmul.f32 %v2835_v13, %v2831_v9 }
 0x4b3   : > { %v998_v19 = vmul.f32 %v2837_v16, %v2833_v12  ;;  %2653 = vmatprep.subr.bf16.mxu0 %v2956_v1 }
 0x4b4   : > { %v1002_v20 = vpack.c.bf16 %v997_v17, %v997_v17 }
 0x4b5   : > { %2650 = vmatmul.mubr.msk.bf16.vlgmr.msra.gmra.mrb[12].mxu0 %vm1022_vm2, %v2813_v15  ;;  %v1003_v21 = vpack.c.bf16 %v998_v19, %v998_v19 }
 0x4b6   : > { %v1027_v22 = vsel %vm540_vm1, %v1002_v20, 0  ;;  %2657 = vmatprep.mubr.msk.bf16.mxu0 %vm2959_vm0, %v2956_v1 }
 0x4b7   : > { %2506 = vmatprep.subr.msk.bf16.mxu1 %vm540_vm1, %v1003_v21  ;;  %v2814_v21 = vld [vmem:[%s3634_s6 + $0x8] sm:$0xff]  }
 0x4b8   : > { %1036 = vmatpush1.bf16.msra.mxu1 %v1027_v22 }
 0x4bb   : > { %2507 = vmatmul.mubr.msk.bf16.vlgmr.msra.gmra.mrb[8].mxu1 %vm1022_vm2, %v2813_v15 }
 0x4bc   : > { %1255 = vmatprep.mubr.bf16.mxu1 %v2960_v5 }
 0x588   : > { %v1112_v25 = vpop.f32.mrb[12].mxu0 }
 0x589   : > { %v2651_v26 = vpop.f32.mrb[13].mxu0  ;;  %v1113_v36 = vadd.f32 %v1112_v25, %v1010_v34 }
 0x58a   : > { %v3243_v28 = vpop.f32.mrb[14].mxu0 }
 0x58b   : > { %v2652_v30 = vpop.f32.mrb[15].mxu0  ;;  %v1121_v47 = vadd.f32 %v1113_v36, %v3189_v11 }
 0x58d   : > { %v1140_v51 = vmul.f32 %v3265_v49, %v1121_v47 }
 0x58e   : > { %v1069_v35 = vpop.f32.mrb[8].mxu1 }
 0x58f   : > { %v1070_v37 = vadd.f32 %v1069_v35, %v1010_v34  ;;  %v1071_v38 = vpop.f32.mrb[9].mxu1 }
 0x590   : > { %v1072_v41 = vadd.f32 %v1071_v38, %v1010_v34  ;;  %v3255_v42 = vpop.f32.mrb[10].mxu1 }
 0x591   : > { %v1119_v44 = vadd.f32 %v1070_v37, %v3200_v24  ;;  %v3260_v45 = vpop.f32.mrb[11].mxu1 }
 0x592   : > { %v1120_v46 = vadd.f32 %v1072_v41, %v3193_v18 }
 0x593   : > { %v1138_v48 = vmul.f32 %v3252_v39, %v1119_v44 }
 0x594   : > { %v1139_v50 = vmul.f32 %v3257_v43, %v1120_v46 }
 0x595   : > { %1144 = vrot.lane.b32.xlu0 %v1138_v48, %s3669_s27 }
 0x596   : > { %1146 = vrot.lane.b32.xlu1 %v1139_v50, %s3669_s27 }
 0x599   : > { %1148 = vrot.lane.b32.xlu0 %v1140_v51, %s3669_s27 }
 0x607   : > { %v1145_v24 = vpop.permute.xlu0 %1144 }
 0x608   : > { %1155 = vst.msk [vmem:[#allocation2] sm:$0xff] %vm748_vm6, %v1145_v24  ;;  %v1147_v18 = vpop.permute.xlu1 %1146 }
 0x609   : > { %v1150_v11 = vsel %vm719_vm3, %v1145_v24, %v1147_v18 }
 0x60a   : > { %1175 = vrot.lane.b32.xlu1 %v1150_v11, %s3670_s16 }
 0x60b   : > { %v1149_v52 = vpop.permute.xlu0 %1148 }
 0x60c   : > { %v1151_v53 = vsel %vm719_vm3, %v1147_v18, %v1149_v52 }
 0x60d   : > { %1157 = vst.msk [vmem:[#allocation2 + $0x10] sm:$0xff] %vm783_vm9, %v1151_v53 }
 0x60f   : > { %v1161_v54 = vld [vmem:[#allocation2] sm:$0xff] }
 0x610   : > { %1173 = vrot.lane.b32.xlu1 %v1161_v54, %s3670_s16 }
 0x614   : > { %v1163_v56 = vld [vmem:[#allocation2 + $0x10] sm:$0xff]  ;;  %1184 = vrot.lane.b32.xlu1 %v1161_v54, %s3671_s17 }
 0x615   : > { %1177 = vrot.lane.b32.xlu0 %v1163_v56, %s3670_s16  ;;  %v2790_v58 = vpack.i.bf16 %v1163_v56, %v1150_v11 }
 0x618   : > { %1207 = vperm.xlu1 %2779, %v2511_v57  }
 0x619   : > { %2791 = vrot.lane.b32.xlu0 %v2790_v58, %s3671_s17 }
 0x61d   : > { %1212 = vperm.xlu0 %2778, %v2512_v59  }
 0x621   : > { %1342 = vperm.xlu0 %2778, %v2521_v60  }
 0x67c   : > { %v1176_v61 = vpop.permute.xlu1 %1175 }
 0x682   : > { %v1174_v62 = vpop.permute.xlu1 %1173 }
 0x683   : > { %v3293_v3 = vsel %vm816_vm14, %v1174_v62, %v1176_v61 }
 0x684   : > { %v1196_v9 = vpack.c.bf16 %v3293_v3, %v1161_v54 }
 0x686   : > { %v1185_v14 = vpop.permute.xlu1 %1184 }
 0x687   : > { %v3290_v63 = vpop.permute.xlu0 %1177 }
 0x688   : > { %v3297_v4 = vsel %vm816_vm14, %v1176_v61, %v3290_v63  ;;  %v1198_v7 = vpack.c.bf16 %v3290_v63, %v1163_v56 }
 0x689   : > { %v1197_v8 = vpack.c.bf16 %v3297_v4, %v1150_v11 }
 0x68a   : > { %2654 = vmatpush3.bf16.msra.mxu0 %v1198_v7 }
 0x68b   : > { %1223 = vmatprep.subr.bf16.mxu1 %v1197_v8  ;;  %v2792_v10 = vpop.permute.xlu0 %2791  ;;  %2655 = vmatprep.subr.bf16.mxu0 %v2956_v1 }
 0x68c   : > { %v2794_v12 = vunpack.i.h.bf16 %v2792_v10  ;;  %v2793_v13 = vunpack.i.l.bf16 %v2792_v10  ;;  %1224 = vmatpush1.bf16.msra.mxu1 %v1196_v9  ;;  %v2815_v10 = vld [vmem:[%s3636_s8 + $0x8] sm:$0xff]  }
 0x68e   : > { %v1201_v15 = vpack.c.bf16 %v3171_v0, %v2794_v12  ;;  %v1191_v16 = vsel %vm1190_vm4, %v1185_v14, %v2793_v13  ;;  %v1192_v17 = vsel %vm1190_vm4, %v2793_v13, %v2794_v12 }
 0x68f   : > { %v1199_v19 = vpack.c.bf16 %v3166_v55, %v1191_v16  ;;  %v1200_v20 = vpack.c.bf16 %v3173_v2, %v1192_v17 }
 0x690   : > { %2656 = vmatpush3.bf16.msra.mxu0 %v1201_v15 }
 0x691   : > { %1225 = vmatprep.subr.bf16.mxu1 %v1200_v20  ;;  %2661 = vmatprep.subr.bf16.mxu0 %v2956_v1 }
 0x692   : > { %1226 = vmatpush1.bf16.msra.mxu1 %v1199_v19 }
 0x693   : > { %2658 = vmatmul.mubr.msk.bf16.vlgmr.msra.gmra.mrb[16].mxu0 %vm662_vm10, %v2814_v21 }
 0x694   : > { %2663 = vmatprep.mubr.msk.bf16.mxu0 %vm2959_vm0, %v2956_v1 }
 0x695   : > { %2514 = vmatmul.mubr.msk.bf16.vlgmr.msra.gmra.mrb[12].mxu1 %vm662_vm10, %v2814_v21 }
 0x696   : > { %1399 = vmatprep.mubr.bf16.mxu1 %v2960_v5 }
 0x697   : > { %v1208_v44 = vpop.permute.xlu1 %1207 }
 0x69c   : > { %v1213_v23 = vpop.permute.xlu0 %1212 }
 0x6a0   : > { %v1343_v16 = vpop.permute.xlu0 %1342 }
 0x766   : > { %v1300_v22 = vpop.f32.mrb[16].mxu0 }
 0x767   : > { %v2659_v25 = vpop.f32.mrb[17].mxu0  ;;  %v1301_v46 = vadd.f32 %v1300_v22, %v1208_v44 }
 0x768   : > { %v1257_v26 = vpop.f32.mrb[12].mxu1  ;;  %v1303_v29 = vpop.f32.mrb[18].mxu0 }
 0x769   : > { %v1304_v30 = vadd.f32 %v1303_v29, %v1213_v23  ;;  %v1259_v32 = vpop.f32.mrb[13].mxu1  ;;  %v2660_v33 = vpop.f32.mrb[19].mxu0  ;;  %v1258_v47 = vadd.f32 %v1257_v26, %v1208_v44 }
 0x76a   : > { %v1261_v34 = vpop.f32.mrb[14].mxu1  ;;  %v1260_v50 = vadd.f32 %v1259_v32, %v1208_v44 }
 0x76b   : > { %v2518_v35 = vmul.f32 -1.442695, %v1304_v30  ;;  %v1262_v36 = vadd.f32 %v1261_v34, %v1213_v23  ;;  %v1263_v37 = vpop.f32.mrb[15].mxu1 }
 0x76c   : > { %v1264_v38 = vadd.f32 %v1263_v37, %v1213_v23 }
 0x76d   : > { %2838 = vpow2.f32 %v2518_v35  ;;  %v2516_v40 = vmul.f32 -1.442695, %v1262_v36 }
 0x76e   : > { %v2517_v41 = vmul.f32 -1.442695, %v1264_v38 }
 0x76f   : > { %2840 = vpow2.f32 %v2516_v40 }
 0x770   : > { %2842 = vpow2.f32 %v2517_v41 }
 0x771   : > { %2844 = vtanh.f32 %v1301_v46 }
 0x772   : > { %2846 = vtanh.f32 %v1258_v47 }
 0x777   : > { %v2839_v48 = vpop.eup %2838 }
 0x778   : > { %v1321_v51 = vadd.f32 1.0, %v2839_v48 }
 0x779   : > { %v2841_v24 = vpop.eup %2840 }
 0x77a   : > { %v2843_v18 = vpop.eup %2842  ;;  %2848 = vrcp.f32 %v1321_v51  ;;  %v1319_v11 = vadd.f32 1.0, %v2841_v24 }
 0x77b   : > { %2850 = vtanh.f32 %v1260_v50  ;;  %v1320_v52 = vadd.f32 1.0, %v2843_v18  ;;  %v2845_v53 = vpop.eup %2844 }
 0x77c   : > { %2852 = vrcp.f32 %v1319_v11  ;;  %v2847_v54 = vpop.eup %2846 }
 0x77d   : > { %2854 = vrcp.f32 %v1320_v52 }
 0x784   : > { %v2849_v56 = vpop.eup %2848 }
 0x785   : > { %v2851_v57 = vpop.eup %2850  ;;  %v1330_v58 = vmul.f32 %v2849_v56, %v2845_v53 }
 0x786   : > { %v2853_v59 = vpop.eup %2852 }
 0x787   : > { %v2855_v60 = vpop.eup %2854  ;;  %v1336_v61 = vpack.c.bf16 %v1330_v58, %v1330_v58  ;;  %v1328_v62 = vmul.f32 %v2853_v59, %v2847_v54 }
 0x788   : > { %v1329_v7 = vmul.f32 %v2855_v60, %v2851_v57 }
 0x789   : > { %v1365_v8 = vsel %vm540_vm1, %v1336_v61, 0  ;;  %v1334_v9 = vpack.c.bf16 %v1328_v62, %v1328_v62 }
 0x78a   : > { %2662 = vmatpush3.bf16.msra.mxu0 %v1365_v8  ;;  %v1335_v12 = vpack.c.bf16 %v1329_v7, %v1329_v7 }
 0x78b   : > { %v1359_v13 = vsel %vm540_vm1, %v1334_v9, 0  ;;  %2667 = vmatprep.subr.bf16.mxu0 %v2956_v1 }
 0x78c   : > { %2524 = vmatprep.subr.msk.bf16.mxu1 %vm540_vm1, %v1335_v12  ;;  %v2529_v12 = vld [vmem:[%s3635_s7 + $0x20] sm:$0xff] }
 0x78d   : > { %1368 = vmatpush1.bf16.msra.mxu1 %v1359_v13  ;;  %2664 = vmatmul.mubr.msk.bf16.vlgmr.msra.gmra.mrb[20].mxu0 %vm1022_vm2, %v2815_v10  ;;  %v2530_v13 = vld [vmem:[%s3635_s7 + $0x28] sm:$0xff] }
 0x78e   : > { %2671 = vmatprep.mubr.msk.bf16.mxu0 %vm2959_vm0, %v2956_v1 }
 0x790   : > { %2525 = vmatmul.mubr.msk.bf16.vlgmr.msra.gmra.mrb[16].mxu1 %vm1022_vm2, %v2815_v10 }
 0x791   : > { %1618 = vmatprep.mubr.bf16.mxu1 %v2960_v5 }
 0x860   : > { %v1444_v14 = vpop.f32.mrb[20].mxu0 }
 0x861   : > { %v2665_v15 = vpop.f32.mrb[21].mxu0  ;;  %v1445_v21 = vadd.f32 %v1444_v14, %v1343_v16  ;;  %v2539_v14 = vld [vmem:[%s3637_s9 + $0x20] sm:$0xff] }
 0x862   : > { %v3329_v17 = vpop.f32.mrb[22].mxu0 }
 0x863   : > { %v1401_v19 = vpop.f32.mrb[16].mxu1  ;;  %v2666_v20 = vpop.f32.mrb[23].mxu0  ;;  %v1453_v33 = vadd.f32 %v1445_v21, %v3290_v63 }
 0x864   : > { %v1402_v22 = vadd.f32 %v1401_v19, %v1343_v16  ;;  %v1403_v23 = vpop.f32.mrb[17].mxu1 }
 0x865   : > { %v1404_v25 = vadd.f32 %v1403_v23, %v1343_v16  ;;  %v3331_v26 = vpop.f32.mrb[18].mxu1  ;;  %v1456_v36 = vmul.f32 %v1453_v33, %v3265_v49 }
 0x866   : > { %v1451_v29 = vadd.f32 %v1402_v22, %v3293_v3  ;;  %v3334_v30 = vpop.f32.mrb[19].mxu1 }
 0x867   : > { %v1452_v32 = vadd.f32 %v1404_v25, %v3297_v4 }
 0x868   : > { %v1454_v34 = vmul.f32 %v1451_v29, %v3252_v39  ;;  %v2816_v29 = vld [vmem:[%s3634_s6 + $0x10] sm:$0xff]  }
 0x869   : > { %v1455_v35 = vmul.f32 %v1452_v32, %v3257_v43 }
 0x86a   : > { %1460 = vrot.lane.b32.xlu1 %v1454_v34, %s3669_s27 }
 0x86b   : > { %1462 = vrot.lane.b32.xlu0 %v1455_v35, %s3669_s27 }
 0x86e   : > { %1464 = vrot.lane.b32.xlu1 %v1456_v36, %s3669_s27 }
 0x86f   : > { %2796 = vrot.lane.b32.xlu0 %v3180_v6, %s3672_s24 }
 0x8dc   : > { %v1461_v3 = vpop.permute.xlu1 %1460 }
 0x8dd   : > { %1471 = vst.msk [vmem:[#allocation2] sm:$0xff] %vm748_vm6, %v1461_v3  ;;  %v1463_v4 = vpop.permute.xlu0 %1462 }
 0x8de   : > { %v1466_v40 = vsel %vm719_vm3, %v1461_v3, %v1463_v4 }
 0x8e0   : > { %v1465_v63 = vpop.permute.xlu1 %1464 }
 0x8e1   : > { %v1467_v37 = vsel %vm719_vm3, %v1463_v4, %v1465_v63  ;;  %v2797_v46 = vpop.permute.xlu0 %2796 }
 0x8e2   : > { %1473 = vst.msk [vmem:[#allocation2 + $0x10] sm:$0xff] %vm783_vm9, %v1467_v37  ;;  %v2799_v50 = vunpack.i.h.bf16 %v2797_v46  ;;  %v2798_v51 = vunpack.i.l.bf16 %v2797_v46 }
 0x8e4   : > { %v1483_v38 = vld [vmem:[#allocation2] sm:$0xff]  ;;  %v1526_v56 = vsel %vm831_vm15, %v2798_v51, %v2799_v50 }
 0x8e5   : > { %1495 = vrot.lane.b32.xlu1 %v1483_v38, %s3668_s18 }
 0x8e9   : > { %v1485_v41 = vld [vmem:[#allocation2 + $0x10] sm:$0xff] }
 0x8ea   : > { %1510 = vrot.lane.b32.xlu1 %v1485_v41, %s3670_s16  ;;  %v2800_v44 = vpack.i.bf16 %v1485_v41, %v1466_v40 }
 0x8ec   : > { %2801 = vrot.lane.b32.xlu0 %v2800_v44, %s3668_s18 }
 0x8ee   : > { %1524 = vrot.lane.b32.xlu1 %v3171_v0, %s3672_s24 }
 0x8f0   : > { %1508 = vrot.lane.b32.xlu0 %v1466_v40, %s3670_s16 }
 0x8f4   : > { %1506 = vrot.lane.b32.xlu0 %v1483_v38, %s3670_s16 }
 0x957   : > { %v1496_v6 = vpop.permute.xlu1 %1495 }
 0x95c   : > { %v3357_v47 = vpop.permute.xlu1 %1510 }
 0x95e   : > { %v2802_v48 = vpop.permute.xlu0 %2801 }
 0x95f   : > { %v2804_v24 = vunpack.i.h.bf16 %v2802_v48  ;;  %v2803_v18 = vunpack.i.l.bf16 %v2802_v48 }
 0x960   : > { %v1525_v59 = vpop.permute.xlu1 %1524 }
 0x961   : > { %v1533_v11 = vpack.c.bf16 %v2804_v24, %v1485_v41  ;;  %v1502_v52 = vsel %vm804_vm13, %v2803_v18, %v2804_v24  ;;  %v1501_v58 = vsel %vm804_vm13, %v1496_v6, %v2803_v18  ;;  %v1527_v7 = vsel %vm831_vm15, %v2799_v50, %v1525_v59 }
 0x962   : > { %v1509_v53 = vpop.permute.xlu0 %1508  ;;  %v1532_v54 = vpack.c.bf16 %v1502_v52, %v1466_v40  ;;  %v1531_v62 = vpack.c.bf16 %v1501_v58, %v1483_v38  ;;  %v1536_v10 = vpack.c.bf16 %v1527_v7, %v3357_v47 }
 0x963   : > { %v3363_v57 = vsel %vm816_vm14, %v1509_v53, %v3357_v47  ;;  %1565 = vrot.lane.b32.xlu0 %v1533_v11, %s3668_s18 }
 0x964   : > { %v1535_v60 = vpack.c.bf16 %v1526_v56, %v3363_v57  ;;  %1563 = vrot.lane.b32.xlu1 %v1532_v54, %s3668_s18 }
 0x966   : > { %v1507_v61 = vpop.permute.xlu0 %1506 }
 0x967   : > { %v3371_v8 = vsel %vm816_vm14, %v1507_v61, %v1509_v53  ;;  %1569 = vrot.lane.b32.xlu0 %v1535_v60, %s3668_s18 }
 0x968   : > { %v1534_v9 = vpack.c.bf16 %v2798_v51, %v3371_v8  ;;  %1561 = vrot.lane.b32.xlu1 %v1531_v62, %s3668_s18 }
 0x96b   : > { %1567 = vrot.lane.b32.xlu0 %v1534_v9, %s3668_s18 }
 0x96c   : > { %1571 = vrot.lane.b32.xlu1 %v1536_v10, %s3668_s18  ;;  %s2898_s18 = scalar_lea.vmem %s2897_s26, 64 }
 0x96f   : > { %1542 = vperm.xlu0 %2778, %v2529_v12  }
 0x970   : > { %1547 = vperm.xlu1 %2779, %v2530_v13  }
 0x974   : > { %1705 = vperm.xlu1 %2779, %v2539_v14  }
 0x9d5   : > { %v1566_v15 = vpop.permute.xlu0 %1565 }
 0x9d6   : > { %2668 = vmatpush3.bf16.msra.mxu0 %v1566_v15  ;;  %v1564_v16 = vpop.permute.xlu1 %1563 }
 0x9d7   : > { %v1574_v19 = vsel %vm804_vm13, %v1564_v16, %v1566_v15  ;;  %2669 = vmatprep.subr.bf16.mxu0 %v2956_v1 }
 0x9d8   : > { %1586 = vmatprep.subr.bf16.mxu1 %v1574_v19 }
 0x9d9   : > { %v1570_v20 = vpop.permute.xlu0 %1569 }
 0x9da   : > { %v1562_v21 = vpop.permute.xlu1 %1561 }
 0x9db   : > { %v1573_v22 = vsel %vm804_vm13, %v1562_v21, %v1564_v16 }
 0x9dc   : > { %1587 = vmatpush1.bf16.msra.mxu1 %v1573_v22 }
 0x9dd   : > { %v1568_v23 = vpop.permute.xlu0 %1567 }
 0x9de   : > { %v1572_v25 = vpop.permute.xlu1 %1571  ;;  %v1575_v33 = vsel %vm804_vm13, %v1568_v23, %v1570_v20 }
 0x9df   : > { %2670 = vmatpush3.bf16.msra.mxu0 %v1572_v25  ;;  %v1576_v32 = vsel %vm804_vm13, %v1570_v20, %v1572_v25  ;;  %v2817_v20 = vld [vmem:[%s3636_s8 + $0x10] sm:$0xff]  }
 0x9e0   : > { %1588 = vmatprep.subr.bf16.mxu1 %v1576_v32  ;;  %2675 = vmatprep.subr.bf16.mxu0 %v2956_v1 }
 0x9e1   : > { %1589 = vmatpush1.bf16.msra.mxu1 %v1575_v33 }
 0x9e2   : > { %2672 = vmatmul.mubr.msk.bf16.vlgmr.msra.gmra.mrb[24].mxu0 %vm662_vm10, %v2816_v29 }
 0x9e3   : > { %2677 = vmatprep.mubr.msk.bf16.mxu0 %vm2959_vm0, %v2956_v1 }
 0x9e4   : > { %2532 = vmatmul.mubr.msk.bf16.vlgmr.msra.gmra.mrb[20].mxu1 %vm662_vm10, %v2816_v29 }
 0x9e5   : > { %1762 = vmatprep.mubr.bf16.mxu1 %v2960_v5 }
 0x9ee   : > { %v1543_v51 = vpop.permute.xlu0 %1542 }
 0x9ef   : > { %v1548_v35 = vpop.permute.xlu1 %1547 }
 0x9f3   : > { %v1706_v29 = vpop.permute.xlu1 %1705 }
 0xab5   : > { %v1663_v34 = vpop.f32.mrb[24].mxu0 }
 0xab6   : > { %v2673_v36 = vpop.f32.mrb[25].mxu0  ;;  %v1664_v24 = vadd.f32 %v1663_v34, %v1543_v51 }
 0xab7   : > { %v1620_v3 = vpop.f32.mrb[20].mxu1  ;;  %v1666_v4 = vpop.f32.mrb[26].mxu0 }
 0xab8   : > { %v1667_v63 = vadd.f32 %v1666_v4, %v1548_v35  ;;  %v1622_v37 = vpop.f32.mrb[21].mxu1  ;;  %v2674_v38 = vpop.f32.mrb[27].mxu0  ;;  %v1621_v18 = vadd.f32 %v1620_v3, %v1543_v51 }
 0xab9   : > { %v1624_v40 = vpop.f32.mrb[22].mxu1  ;;  %v1623_v52 = vadd.f32 %v1622_v37, %v1543_v51 }
 0xaba   : > { %v2536_v41 = vmul.f32 -1.442695, %v1667_v63  ;;  %v1625_v44 = vadd.f32 %v1624_v40, %v1548_v35  ;;  %v1626_v6 = vpop.f32.mrb[23].mxu1 }
 0xabb   : > { %v1627_v46 = vadd.f32 %v1626_v6, %v1548_v35 }
 0xabc   : > { %2856 = vpow2.f32 %v2536_v41  ;;  %v2534_v48 = vmul.f32 -1.442695, %v1625_v44 }
 0xabd   : > { %v2535_v50 = vmul.f32 -1.442695, %v1627_v46 }
 0xabe   : > { %2858 = vpow2.f32 %v2534_v48 }
 0xabf   : > { %2860 = vpow2.f32 %v2535_v50 }
 0xac0   : > { %2862 = vtanh.f32 %v1664_v24 }
 0xac1   : > { %2864 = vtanh.f32 %v1621_v18  ;;  %v2547_v18 = vld [vmem:[%s3635_s7 + $0x30] sm:$0xff] }
 0xac6   : > { %v2857_v11 = vpop.eup %2856 }
 0xac7   : > { %v1684_v53 = vadd.f32 1.0, %v2857_v11 }
 0xac8   : > { %v2859_v54 = vpop.eup %2858 }
 0xac9   : > { %v2861_v56 = vpop.eup %2860  ;;  %2866 = vrcp.f32 %v1684_v53  ;;  %v1682_v58 = vadd.f32 1.0, %v2859_v54  ;;  %v2548_v53 = vld [vmem:[%s3635_s7 + $0x38] sm:$0xff] }
 0xaca   : > { %2868 = vtanh.f32 %v1623_v52  ;;  %v1683_v59 = vadd.f32 1.0, %v2861_v56  ;;  %v2863_v60 = vpop.eup %2862  ;;  %v2522_v52 = vld [vmem:[%s3637_s9 + $0x18] sm:$0xff]  ;;  %v1006_v56 = vld [vmem:[%s3637_s9 + $0x8] sm:$0xff] }
 0xacb   : > { %2870 = vrcp.f32 %v1682_v58  ;;  %v2865_v61 = vpop.eup %2864  ;;  %v2558_v54 = vld [vmem:[%s3637_s9 + $0x38] sm:$0xff]  ;;  %v2557_v58 = vld [vmem:[%s3637_s9 + $0x30] sm:$0xff] }
 0xacc   : > { %2872 = vrcp.f32 %v1683_v59  ;;  %v2540_v59 = vld [vmem:[%s3637_s9 + $0x28] sm:$0xff] }
 0xad3   : > { %v2867_v62 = vpop.eup %2866 }
 0xad4   : > { %v2869_v7 = vpop.eup %2868  ;;  %v1693_v9 = vmul.f32 %v2867_v62, %v2863_v60  ;;  %v2177_v60 = vld [vmem:[%s3639_s11] sm:$0xff] }
 0xad5   : > { %v2871_v10 = vpop.eup %2870 }
 0xad6   : > { %v2873_v12 = vpop.eup %2872  ;;  %v1699_v13 = vpack.c.bf16 %v1693_v9, %v1693_v9  ;;  %v1691_v14 = vmul.f32 %v2871_v10, %v2865_v61  ;;  %v2283_v61 = vld [vmem:[#allocation5] sm:$0x1] }
 0xad7   : > { %v1692_v15 = vmul.f32 %v2873_v12, %v2869_v7 }
 0xad8   : > { %v1728_v16 = vsel %vm540_vm1, %v1699_v13, 0  ;;  %v1697_v19 = vpack.c.bf16 %v1691_v14, %v1691_v14 }
 0xad9   : > { %2676 = vmatpush3.bf16.msra.mxu0 %v1728_v16  ;;  %v1698_v21 = vpack.c.bf16 %v1692_v15, %v1692_v15 }
 0xada   : > { %v1722_v22 = vsel %vm540_vm1, %v1697_v19, 0  ;;  %2681 = vmatprep.subr.bf16.mxu0 %v2956_v1 }
 0xadb   : > { %2542 = vmatprep.subr.msk.bf16.mxu1 %vm540_vm1, %v1698_v21 }
 0xadc   : > { %1731 = vmatpush1.bf16.msra.mxu1 %v1722_v22  ;;  %2678 = vmatmul.mubr.msk.bf16.vlgmr.msra.gmra.mrb[28].mxu0 %vm1022_vm2, %v2817_v20 }
 0xadd   : > { %2685 = vmatprep.mubr.msk.bf16.mxu0 %vm2959_vm0, %v2956_v1 }
 0xadf   : > { %2543 = vmatmul.mubr.msk.bf16.vlgmr.msra.gmra.mrb[24].mxu1 %vm1022_vm2, %v2817_v20 }
 0xae0   : > { %1939 = vmatprep.mubr.bf16.mxu1 %v2960_v5 }
 0xbaf   : > { %v1807_v23 = vpop.f32.mrb[28].mxu0 }
 0xbb0   : > { %v2679_v25 = vpop.f32.mrb[29].mxu0  ;;  %v1808_v35 = vadd.f32 %v1807_v23, %v1706_v29 }
 0xbb1   : > { %v3414_v32 = vpop.f32.mrb[30].mxu0 }
 0xbb2   : > { %v1764_v33 = vpop.f32.mrb[24].mxu1  ;;  %v2680_v34 = vpop.f32.mrb[31].mxu0  ;;  %v1816_v41 = vadd.f32 %v1808_v35, %v3357_v47 }
 0xbb3   : > { %v1765_v36 = vadd.f32 %v1764_v33, %v1706_v29  ;;  %v1766_v3 = vpop.f32.mrb[25].mxu1  ;;  %v2818_v34 = vld [vmem:[%s3634_s6 + $0x18] sm:$0xff]  }
 0xbb4   : > { %v1767_v4 = vadd.f32 %v1766_v3, %v1706_v29  ;;  %v3416_v63 = vpop.f32.mrb[26].mxu1  ;;  %v1819_v46 = vmul.f32 %v1816_v41, %v3265_v49 }
 0xbb5   : > { %v1814_v37 = vadd.f32 %v1765_v36, %v3371_v8  ;;  %v3419_v38 = vpop.f32.mrb[27].mxu1 }
 0xbb6   : > { %v1815_v40 = vadd.f32 %v1767_v4, %v3363_v57 }
 0xbb7   : > { %v1817_v44 = vmul.f32 %v1814_v37, %v3252_v39 }
 0xbb8   : > { %v1818_v6 = vmul.f32 %v1815_v40, %v3257_v43 }
 0xbb9   : > { %1823 = vrot.lane.b32.xlu0 %v1817_v44, %s3669_s27 }
 0xbba   : > { %1825 = vrot.lane.b32.xlu1 %v1818_v6, %s3669_s27 }
 0xbbd   : > { %1827 = vrot.lane.b32.xlu0 %v1819_v46, %s3669_s27 }
 0xc2b   : > { %v1824_v48 = vpop.permute.xlu0 %1823 }
 0xc2c   : > { %1834 = vst.msk [vmem:[#allocation2] sm:$0xff] %vm748_vm6, %v1824_v48  ;;  %v1826_v8 = vpop.permute.xlu1 %1825 }
 0xc2d   : > { %v1829_v57 = vsel %vm719_vm3, %v1824_v48, %v1826_v8 }
 0xc2e   : > { %1860 = vrot.lane.b32.xlu1 %v1829_v57, %s3670_s16 }
 0xc2f   : > { %v1828_v47 = vpop.permute.xlu0 %1827 }
 0xc30   : > { %v1830_v50 = vsel %vm719_vm3, %v1826_v8, %v1828_v47 }
 0xc31   : > { %1836 = vst.msk [vmem:[#allocation2 + $0x10] sm:$0xff] %vm783_vm9, %v1830_v50 }
 0xc33   : > { %v1846_v51 = vld [vmem:[#allocation2] sm:$0xff] }
 0xc34   : > { %1858 = vrot.lane.b32.xlu1 %v1846_v51, %s3670_s16 }
 0xc38   : > { %v1848_v24 = vld [vmem:[#allocation2 + $0x10] sm:$0xff]  ;;  %1869 = vrot.lane.b32.xlu1 %v1846_v51, %s3671_s17 }
 0xc39   : > { %1862 = vrot.lane.b32.xlu0 %v1848_v24, %s3670_s16  ;;  %v2805_v11 = vpack.i.bf16 %v1848_v24, %v1829_v57 }
 0xc3c   : > { %1891 = vperm.xlu1 %2779, %v2547_v18  }
 0xc3d   : > { %2806 = vrot.lane.b32.xlu0 %v2805_v11, %s3671_s17 }
 0xc40   : > { %1347 = vperm.xlu1 %2779, %v2522_v52  }
 0xc41   : > { %1896 = vperm.xlu0 %2778, %v2548_v53  }
 0xc44   : > { %2031 = vperm.xlu1 %2779, %v2558_v54  }
 0xc45   : > { %1014 = vperm.xlu0 %2778, %v1006_v56  }
 0xc48   : > { %2026 = vperm.xlu1 %2779, %v2557_v58  }
 0xc49   : > { %1710 = vperm.xlu0 %2778, %v2540_v59  }
 0xc4d   : > { %2180 = vperm.xlu0 %2778, %v2177_v60  }
 0xc51   : > { %2286 = vperm.xlu0 %2778, %v2283_v61  }
 0xca0   : > { %v1861_v62 = vpop.permute.xlu1 %1860 }
 0xca6   : > { %v1859_v7 = vpop.permute.xlu1 %1858 }
 0xca7   : > { %v3465_v10 = vsel %vm816_vm14, %v1859_v7, %v1861_v62 }
 0xca8   : > { %v1880_v15 = vpack.c.bf16 %v3465_v10, %v1846_v51 }
 0xcaa   : > { %v1870_v21 = vpop.permute.xlu1 %1869 }
 0xcab   : > { %v3462_v9 = vpop.permute.xlu0 %1862 }
 0xcac   : > { %v3469_v12 = vsel %vm816_vm14, %v1861_v62, %v3462_v9  ;;  %v1882_v13 = vpack.c.bf16 %v3462_v9, %v1848_v24 }
 0xcad   : > { %v1881_v14 = vpack.c.bf16 %v3469_v12, %v1829_v57 }
 0xcae   : > { %2682 = vmatpush3.bf16.msra.mxu0 %v1882_v13 }
 0xcaf   : > { %1907 = vmatprep.subr.bf16.mxu1 %v1881_v14  ;;  %v2807_v16 = vpop.permute.xlu0 %2806  ;;  %2683 = vmatprep.subr.bf16.mxu0 %v2956_v1 }
 0xcb0   : > { %v2809_v19 = vunpack.i.h.bf16 %v2807_v16  ;;  %v2808_v20 = vunpack.i.l.bf16 %v2807_v16  ;;  %1908 = vmatpush1.bf16.msra.mxu1 %v1880_v15 }
 0xcb2   : > { %v1885_v22 = vpack.c.bf16 %v3171_v0, %v2809_v19  ;;  %v1875_v23 = vsel %vm1190_vm4, %v1870_v21, %v2808_v20  ;;  %v1876_v25 = vsel %vm1190_vm4, %v2808_v20, %v2809_v19 }
 0xcb3   : > { %v1883_v29 = vpack.c.bf16 %v3166_v55, %v1875_v23  ;;  %v1884_v33 = vpack.c.bf16 %v3173_v2, %v1876_v25 }
 0xcb4   : > { %2684 = vmatpush3.bf16.msra.mxu0 %v1885_v22 }
 0xcb5   : > { %1909 = vmatprep.subr.bf16.mxu1 %v1884_v33  ;;  %2689 = vmatprep.subr.bf16.mxu0 %v2956_v1 }
 0xcb6   : > { %1910 = vmatpush1.bf16.msra.mxu1 %v1883_v29 }
 0xcb7   : > { %2686 = vmatmul.mubr.msk.bf16.vlgmr.msra.gmra.mrb[32].mxu0 %vm662_vm10, %v2818_v34 }
 0xcb8   : > { %2691 = vmatprep.mubr.msk.bf16.mxu0 %vm2959_vm0, %v2956_v1 }
 0xcb9   : > { %2550 = vmatmul.mubr.msk.bf16.vlgmr.msra.gmra.mrb[28].mxu1 %vm662_vm10, %v2818_v34 }
 0xcba   : > { %2083 = vmatprep.mubr.bf16.mxu1 %v2960_v5 }
 0xcbb   : > { %v1892_v55 = vpop.permute.xlu1 %1891 }
 0xcbf   : > { %v1348_v0 = vpop.permute.xlu1 %1347 }
 0xcc0   : > { %v1897_v2 = vpop.permute.xlu0 %1896  ;;  %v1406_v35 = vadd.f32 %v3331_v26, %v1348_v0  ;;  %v1408_v36 = vadd.f32 %v3334_v30, %v1348_v0  ;;  %v1448_v30 = vadd.f32 %v3329_v17, %v1348_v0 }
 0xcc4   : > { %v1015_v3 = vpop.permute.xlu0 %1014 }
 0xcc5   : > { %v1074_v4 = vadd.f32 %v3255_v42, %v1015_v3  ;;  %v1076_v37 = vadd.f32 %v3260_v45, %v1015_v3  ;;  %v1116_v40 = vadd.f32 %v3243_v28, %v1015_v3 }
 0xcc7   : > { %1160 = vst.msk [vmem:[#allocation4 + $0x10] sm:$0xff] %vm709_vm11, %v1116_v40  ;;  %v1477_v41 = vadd.f32 %v1406_v35, %v1074_v4  ;;  %v1478_v44 = vadd.f32 %v1408_v36, %v1076_v37  ;;  %v2819_v35 = vld [vmem:[%s3636_s8 + $0x18] sm:$0xff]   ;;  %v2032_v4 = vpop.permute.xlu1 %2031 }
 0xcc8   : > { %v1711_v6 = vpop.permute.xlu0 %1710 }
 0xcc9   : > { %v1769_v46 = vadd.f32 %v3416_v63, %v1711_v6  ;;  %v1771_v48 = vadd.f32 %v3419_v38, %v1711_v6  ;;  %v1811_v28 = vadd.f32 %v3414_v32, %v1711_v6 }
 0xccb   : > { %v3497_v8 = vadd.f32 %v1769_v46, %v1477_v41  ;;  %v3499_v26 = vadd.f32 %v1771_v48, %v1478_v44  ;;  %v3519_v41 = vpop.permute.xlu1 %2026 }
 0xcce   : > { %v1476_v42 = vld [vmem:[#allocation4 + $0x10] sm:$0xff] }
 0xccf   : > { %v1479_v57 = vadd.f32 %v1476_v42, %v1448_v30 }
 0xcd1   : > { %1482 = vst.msk [vmem:[#allocation4 + $0x10] sm:$0xff] %vm709_vm11, %v1479_v57 }
 0xcd8   : > { %v1839_v45 = vld [vmem:[#allocation4 + $0x10] sm:$0xff] }
 0xcd9   : > { %v1842_v47 = vadd.f32 %v1839_v45, %v1811_v28 }
 0xcdb   : > { %1845 = vst.msk [vmem:[#allocation4 + $0x10] sm:$0xff] %vm709_vm11, %v1842_v47 }
 0xce2   : > { %v2160_v30 = vld [vmem:[#allocation4 + $0x10] sm:$0xff] }
 0xd8a   : > { %v1984_v50 = vpop.f32.mrb[32].mxu0 }
 0xd8b   : > { %v2687_v63 = vpop.f32.mrb[33].mxu0  ;;  %v1985_v32 = vadd.f32 %v1984_v50, %v1892_v55 }
 0xd8c   : > { %v1941_v51 = vpop.f32.mrb[28].mxu1  ;;  %v1987_v38 = vpop.f32.mrb[34].mxu0 }
 0xd8d   : > { %v1988_v24 = vadd.f32 %v1987_v38, %v1897_v2  ;;  %v1943_v18 = vpop.f32.mrb[29].mxu1  ;;  %v2688_v11 = vpop.f32.mrb[35].mxu0  ;;  %v1942_v60 = vadd.f32 %v1941_v51, %v1892_v55 }
 0xd8e   : > { %v1945_v52 = vpop.f32.mrb[30].mxu1  ;;  %v1944_v62 = vadd.f32 %v1943_v18, %v1892_v55 }
 0xd8f   : > { %v2554_v53 = vmul.f32 -1.442695, %v1988_v24  ;;  %v1946_v17 = vadd.f32 %v1945_v52, %v1897_v2  ;;  %v1947_v54 = vpop.f32.mrb[31].mxu1 }
 0xd90   : > { %v1948_v56 = vadd.f32 %v1947_v54, %v1897_v2 }
 0xd91   : > { %2874 = vpow2.f32 %v2554_v53  ;;  %v2552_v58 = vmul.f32 -1.442695, %v1946_v17 }
 0xd92   : > { %v2553_v59 = vmul.f32 -1.442695, %v1948_v56 }
 0xd93   : > { %2876 = vpow2.f32 %v2552_v58 }
 0xd94   : > { %2878 = vpow2.f32 %v2553_v59  ;;  %v2181_v59 = vpop.permute.xlu0 %2180 }
 0xd95   : > { %2880 = vtanh.f32 %v1985_v32 }
 0xd96   : > { %2882 = vtanh.f32 %v1942_v60 }
 0xd9b   : > { %v2875_v61 = vpop.eup %2874 }
 0xd9c   : > { %v2005_v7 = vadd.f32 1.0, %v2875_v61 }
 0xd9d   : > { %v2877_v13 = vpop.eup %2876 }
 0xd9e   : > { %v2879_v14 = vpop.eup %2878  ;;  %2884 = vrcp.f32 %v2005_v7  ;;  %v2003_v15 = vadd.f32 1.0, %v2877_v13 }
 0xd9f   : > { %2886 = vtanh.f32 %v1944_v62  ;;  %v2004_v16 = vadd.f32 1.0, %v2879_v14  ;;  %v2881_v19 = vpop.eup %2880 }
 0xda0   : > { %2888 = vrcp.f32 %v2003_v15  ;;  %v2883_v20 = vpop.eup %2882 }
 0xda1   : > { %2890 = vrcp.f32 %v2004_v16 }
 0xda8   : > { %v2885_v21 = vpop.eup %2884 }
 0xda9   : > { %v2887_v22 = vpop.eup %2886  ;;  %v2014_v23 = vmul.f32 %v2885_v21, %v2881_v19 }
 0xdaa   : > { %v2889_v25 = vpop.eup %2888 }
 0xdab   : > { %v2891_v29 = vpop.eup %2890  ;;  %v2020_v33 = vpack.c.bf16 %v2014_v23, %v2014_v23  ;;  %v2012_v34 = vmul.f32 %v2889_v25, %v2883_v20 }
 0xdac   : > { %v2013_v55 = vmul.f32 %v2891_v29, %v2887_v22 }
 0xdad   : > { %v2049_v0 = vsel %vm540_vm1, %v2020_v33, 0  ;;  %v2018_v2 = vpack.c.bf16 %v2012_v34, %v2012_v34  ;;  %v2279_v33 = vld [vmem:[%s3640_s12] sm:$0x1] }
 0xdae   : > { %2690 = vmatpush3.bf16.msra.mxu0 %v2049_v0  ;;  %v2019_v36 = vpack.c.bf16 %v2013_v55, %v2013_v55  ;;  %v2287_v55 = vpop.permute.xlu0 %2286 }
 0xdaf   : > { %v2043_v3 = vsel %vm540_vm1, %v2018_v2, 0  ;;  %2695 = vmatprep.subr.bf16.mxu0 %v2956_v1  ;;  %v2292_v2 = vrot.slane %v2287_v55, %v1125_v31 }
 0xdb0   : > { %2560 = vmatprep.subr.msk.bf16.mxu1 %vm540_vm1, %v2019_v36 }
 0xdb1   : > { %2052 = vmatpush1.bf16.msra.mxu1 %v2043_v3  ;;  %2692 = vmatmul.mubr.msk.bf16.vlgmr.msra.gmra.mrb[36].mxu0 %vm1022_vm2, %v2819_v35 }
 0xdb2   : > { %2697 = vmatprep.mubr.msk.bf16.mxu0 %vm2959_vm0, %v2956_v1 }
 0xdb4   : > { %2561 = vmatmul.mubr.msk.bf16.vlgmr.msra.gmra.mrb[32].mxu1 %vm1022_vm2, %v2819_v35 }
 0xdb5   : > { %2227 = vmatprep.mubr.bf16.mxu1 %v2960_v5 }
 0xe84   : > { %v3517_v37 = vpop.f32.mrb[36].mxu0 }
 0xe85   : > { %v2693_v40 = vpop.f32.mrb[37].mxu0  ;;  %v2129_v0 = vadd.f32 %v3517_v37, %v3519_v41 }
 0xe86   : > { %v2131_v44 = vpop.f32.mrb[38].mxu0 }
 0xe87   : > { %v2132_v6 = vadd.f32 %v2131_v44, %v2032_v4  ;;  %v2085_v46 = vpop.f32.mrb[32].mxu1  ;;  %v2694_v48 = vpop.f32.mrb[39].mxu0  ;;  %v2137_v40 = vadd.f32 %v2129_v0, %v3462_v9 }
 0xe88   : > { %v2086_v42 = vadd.f32 %v2085_v46, %v3519_v41  ;;  %v3522_v57 = vpop.f32.mrb[33].mxu1 }
 0xe89   : > { %v2163_v28 = vadd.f32 %v2160_v30, %v2132_v6  ;;  %v2089_v45 = vpop.f32.mrb[34].mxu1  ;;  %v2088_v35 = vadd.f32 %v3522_v57, %v3519_v41  ;;  %v2140_v9 = vmul.f32 %v2137_v40, %v3265_v49 }
 0xe8a   : > { %v2135_v47 = vadd.f32 %v2086_v42, %v3465_v10  ;;  %v2090_v50 = vadd.f32 %v2089_v45, %v2032_v4  ;;  %v2091_v63 = vpop.f32.mrb[35].mxu1 }
 0xe8b   : > { %2166 = vst.msk [vmem:[#allocation4 + $0x10] sm:$0xff] %vm709_vm11, %v2163_v28  ;;  %v2092_v51 = vadd.f32 %v2091_v63, %v2032_v4  ;;  %v2136_v37 = vadd.f32 %v2088_v35, %v3469_v12 }
 0xe8c   : > { %v2161_v38 = vadd.f32 %v2090_v50, %v3497_v8  ;;  %v2138_v24 = vmul.f32 %v2135_v47, %v3252_v39  ;;  %v2173_v8 = vld [vmem:[%s3638_s10] sm:$0xf] }
 0xe8d   : > { %v2162_v18 = vadd.f32 %v2092_v51, %v3499_v26  ;;  %v2139_v42 = vmul.f32 %v2136_v37, %v3257_v43 }
 0xe8e   : > { %2144 = vrot.lane.b32.xlu1 %v2138_v24, %s3669_s27  ;;  %v2170_v11 = vmax.f32 %v2161_v38, 0.0 }
 0xe8f   : > { %v2171_v52 = vmax.f32 %v2162_v18, 0.0 }
 0xe90   : > { %v2174_v53 = vpack.c.bf16 %v2170_v11, %v2170_v11 }
 0xe91   : > { %v2175_v17 = vpack.c.bf16 %v2171_v52, %v2171_v52 }
 0xe92   : > { %v2169_v54 = vld [vmem:[#allocation4 + $0x10] sm:$0xff]  ;;  %v2187_v10 = vsel %vm540_vm1, %v2174_v53, 0 }
 0xe93   : > { %v2172_v56 = vmax.f32 %v2169_v54, 0.0  ;;  %2563 = vmatprep.subr.msk.bf16.mxu1 %vm540_vm1, %v2175_v17 }
 0xe94   : > { %2196 = vmatpush1.bf16.msra.mxu1 %v2187_v10 }
 0xe95   : > { %v2176_v39 = vpack.c.bf16 %v2172_v56, %v2172_v56 }
 0xe97   : > { %v2193_v26 = vsel %vm540_vm1, %v2176_v39, 0  ;;  %2564 = vmatmul.mubr.msk.bf16.vlgmr.msra.gmra.mrb[36].mxu1 %vm1022_vm2, %v2173_v8 }
 0xe98   : > { %2696 = vmatpush3.bf16.msra.mxu0 %v2193_v26  ;;  %2337 = vmatprep.mubr.bf16.mxu1 %v2960_v5 }
 0xe99   : > { %2701 = vmatprep.subr.bf16.mxu0 %v2956_v1 }
 0xe9b   : > { %2698 = vmatmul.mubr.msk.bf16.vlgmr.msra.gmra.mrb[40].mxu0 %vm1022_vm2, %v2173_v8 }
 0xe9c   : > { %2703 = vmatprep.mubr.msk.bf16.mxu0 %vm2959_vm0, %v2956_v1 }
 0xf00   : > { %v3542_v58 = vpop.permute.xlu1 %2144 }
 0xf01   : > { %2155 = vst.msk [vmem:[#allocation2] sm:$0xff] %vm748_vm6, %v3542_v58 }
 0xf6a   : > { %v2229_v32 = vpop.f32.mrb[36].mxu1 }
 0xf6b   : > { %v2230_v60 = vadd.f32 %v2229_v32, %v2181_v59  ;;  %v2231_v61 = vpop.f32.mrb[37].mxu1 }
 0xf6c   : > { %v2232_v62 = vadd.f32 %v2231_v61, %v2181_v59  ;;  %v2233_v7 = vpop.f32.mrb[38].mxu1 }
 0xf6d   : > { %v2276_v13 = vmax.f32 %v2230_v60, 0.0  ;;  %v2234_v5 = vpop.f32.mrb[39].mxu1 }
 0xf6e   : > { %v2270_v14 = vpop.f32.mrb[40].mxu0  ;;  %v2277_v15 = vmax.f32 %v2232_v62, 0.0 }
 0xf6f   : > { %v2271_v16 = vadd.f32 %v2270_v14, %v2181_v59  ;;  %v2280_v19 = vpack.c.bf16 %v2276_v13, %v2276_v13  ;;  %v2699_v20 = vpop.f32.mrb[41].mxu0 }
 0xf70   : > { %v2281_v1 = vpack.c.bf16 %v2277_v15, %v2277_v15  ;;  %v2273_v21 = vpop.f32.mrb[42].mxu0 }
 0xf71   : > { %v2278_v22 = vmax.f32 %v2271_v16, 0.0  ;;  %v2700_v23 = vpop.f32.mrb[43].mxu0  ;;  %v2297_v25 = vsel %vm540_vm1, %v2280_v19, 0 }
 0xf72   : > { %2566 = vmatprep.subr.msk.bf16.mxu1 %vm540_vm1, %v2281_v1 }
 0xf73   : > { %v2282_v29 = vpack.c.bf16 %v2278_v22, %v2278_v22  ;;  %2306 = vmatpush1.bf16.msra.mxu1 %v2297_v25 }
 0xf75   : > { %v2303_v34 = vsel %vm540_vm1, %v2282_v29, 0 }
 0xf76   : > { %2702 = vmatpush3.bf16.msra.mxu0 %v2303_v34  ;;  %2567 = vmatmul.mubr.msk.bf16.vlgmr.msra.gmra.mrb[40].mxu1 %vm1022_vm2, %v2279_v33 }
 0xf79   : > { %2704 = vmatmul.mubr.msk.bf16.vlgmr.msra.gmra.mrb[44].mxu0 %vm1022_vm2, %v2279_v33 }
0x1049   : > { %v2339_v36 = vpop.f32.mrb[40].mxu1 }
0x104a   : > { %v2340_v3 = vadd.f32 %v2339_v36, %v2292_v2  ;;  %v2341_v4 = vpop.f32.mrb[41].mxu1 }
0x104b   : > { %v2342_v44 = vadd.f32 %v2341_v4, %v2292_v2  ;;  %v2343_v6 = vpop.f32.mrb[42].mxu1 }
0x104c   : > { %v2380_v46 = vpop.f32.mrb[44].mxu0  ;;  %2386 = vst [vmem:[%s504_s4] sm:$0x1] %v2340_v3  ;;  %v2344_v48 = vpop.f32.mrb[43].mxu1 }
0x104d   : > { %v2381_v30 = vadd.f32 %v2380_v46, %v2292_v2  ;;  %v2705_v27 = vpop.f32.mrb[45].mxu0  ;;  %2389 = vrot.lane.b32.xlu1 %v2342_v44, %s3671_s17 }
0x104e   : > { %v2383_v31 = vpop.f32.mrb[46].mxu0 }
0x104f   : > { %2391 = vrot.lane.b32.xlu0 %v2381_v30, %s3671_s17  ;;  %v2706_v41 = vpop.f32.mrb[47].mxu0 }
0x1051   : > { %2148 = vrot.lane.b32.xlu1 %v2140_v9, %s3669_s27 }
0x1053   : > { %2146 = vrot.lane.b32.xlu0 %v2139_v42, %s3669_s27  ;;  %s2892_s27 = scalar_lea.vmem %s3572_s5, 32 }
0x1054   : > { %p2893_p11 = scmp.ne.s32.totalorder %s3572_s5, %s2892_s27  ;;  %p2900_p1 = scmp.lt.s32.totalorder %s2898_s18, %s2892_s27 }
0x1056   : > { %p2894_p12 = pnand %p2893_p11, %p3090_p5  ;;  %p2901_p2 = por %p2900_p1, %p2899_p0 }
0x1058   : > { %p2895_p13 = pneg %p2894_p12 }
0x105a   : > { %p2902_p3 = pnand %p2901_p2, %p2895_p13 }
0x10bf   : > { %v2390_v12 = vpop.permute.xlu1 %2389 }
0x10c1   : > { %v2392_v57 = vpop.permute.xlu0 %2391 }
0x10c2   : > { %v2393_v43 = vsel %vm1190_vm4, %v2390_v12, %v2392_v57 }
0x10c3   : > { %2569 = vst [vmem:[%s504_s4 + $0x1] sm:$0x1] %v2393_v43 }
0x10c4   : > { %2905 = shalt.err (!%p2902_p3)
}
0x10c5   : > { %s2906_s19 = scalar_lea.hbm %s3577_s1, 32  ;;  %s2910_s0 = scalar_lea.hbm %s3643_s15, 64 }
0x10c6   : > { %p2907_p4 = scmp.ne.s32.totalorder %s3577_s1, %s2906_s19  ;;  %p2911_p9 = scmp.lt.u32.totalorder %s3577_s1, %s3643_s15 }
0x10c7   : > { %p2912_p10 = scmp.lt.u32.totalorder %s2910_s0, %s2906_s19  ;;  %p2914_p12 = scmp.lt.u32.totalorder %s2906_s19, %s3577_s1 }
0x10c8   : > { %p2908_p7 = pnand %p2907_p4, %p3090_p5 }
0x10c9   : > { %p2913_p11 = por %p2912_p10, %p2911_p9 }
0x10ca   : > { %p2909_p8 = pneg %p2908_p7 }
0x10cb   : > { %p2915_p13 = por %p2914_p12, %p2913_p11 }
0x10cd   : > { %p2916_p0 = pnand %p2915_p13, %p2909_p8 }
0x10cf   : > { %2919 = shalt.err (!%p2916_p0)
}
0x10d0   : > { %s2968_s27 = smov 16   ;;  %v2147_v49 = vpop.permute.xlu0 %2146  ;;  %v2149_v28 = vpop.permute.xlu1 %2148 }
0x10d1   : > { %2707 = dma.vmem_to_hbm [thread:$0]  (%p3090_p5), %s3572_s5, 32, %s3577_s1, %s3582_s2, %s2968_s27, %s2968_s27, %s3672_s24   ;;  %v2150_v45 = vsel %vm719_vm3, %v3542_v58, %v2147_v49  ;;  %v2151_v47 = vsel %vm719_vm3, %v2147_v49, %v2149_v28 }
0x10d2   : > { %2156 = vst [vmem:[#allocation2 + $0x8] sm:$0xff] %v2150_v45  ;;  %2157 = vst.msk [vmem:[#allocation2 + $0x10] sm:$0xff] %vm783_vm9, %v2151_v47 }
0x10d3 PF: > { %p2713_p1 = scmp.ge.s32.totalorder %s2954_s23, 2  ;;  %s2426_s29 = sand.u32 1, %s2942_s20  }
0x10d4   : > { %s2427_s13 = scalar_lea.sflag [#allocation7], %s2426_s29 }
0x10d5   : > { %p2710_p2 = pnand %p2713_p1, %p3094_p6 }
0x10d7   : > { %2937 = dma.done.wait (!%p2710_p2), %s2427_s13, 32  }
0x10d8   : > { %2939 = vsyncadd (!%p2710_p2), %s2427_s13, 4294967264  ;;  %p27_p5 = scmp.ge.s32.totalorder %s3077_s25, 4   ;;  %s3673_s20 = smov %s2946_s21 }
0x10d9   : > { %s3674_s21 = smov %s2950_s22  ;;  %s3675_s22 = smov %s3088_s28 }
0x10da   : > { %s3676_s23 = smov %s3077_s25  ;;  %29 = sbr.rel (!%p27_p5) target bundleno = 10 (0xa), region = 133 }
0x10e1   :  { %2432 = vsyncpa [#allocation7], 1 }
0x10e2   :  { %2434 = vsyncpa [#allocation7 + $0x1], 1 }

</bundles_post_ra>
